<compile_context>
chip_gen: v7x
topology: tpu7x:2x2x1
jax: 0.10.0
libtpu: 0.0.40
codegen_flags: <defaults>
</compile_context>

<pallas_src>
import math

import jax
import jax.numpy as jnp
from jax.experimental import pallas as pl
from jax.experimental.pallas import tpu as pltpu

# ---------------- configuration (mirrors KernelNet.__init__ args) -------------
IN_CH = 1          # dimensionality of relative positions
HID = 32           # hidden_channels
OUT_CH = 16        # out_channels (= conv_in_channels * conv_out_channels)
OMEGA_0 = 30.0
# weight_dropout = 0.0 -> torch.nn.Identity (no dropout at inference)
# norm_type = '' -> Identity (SIREN branch skips norms anyway)


def _round_up(n, m):
    return ((n + m - 1) // m) * m


# ------------------------------- Pallas kernel --------------------------------
def kernelnet_kernel(x_ref, w1_ref, b1_ref, w2_ref, b2_ref, w3_ref, b3_ref,
                     o_ref):
    """Fused 3-layer SIREN MLP over one tile of positions (channels-on-sublanes).

    x_ref : (IN_CH=1, tile_L)   relative positions for one (batch, L-tile)
    w1    : (HID, 1)   b1: (HID, 1)     -- omega_0 already folded in
    w2    : (HID, HID) b2: (HID, 1)     -- omega_0 already folded in
    w3    : (OUT_CH, HID) b3: (OUT_CH, 1)
    o_ref : (OUT_CH, tile_L)
    """
    x = x_ref[...]                                            # (1, tile_L)

    # layer 1: K=1 contraction done on the VPU as a broadcast outer product.
    h = jnp.sin(w1_ref[...] * x + b1_ref[...])                # (HID, tile_L)

    # layer 2: MXU matmul, lane-dense N = tile_L.
    h = jnp.sin(
        jnp.dot(w2_ref[...], h, preferred_element_type=jnp.float32)
        + b2_ref[...])                                        # (HID, tile_L)

    # layer 3: Linear1d -> Dropout(p=0) == Identity.
    o = (jnp.dot(w3_ref[...], h, preferred_element_type=jnp.float32)
         + b3_ref[...])                                       # (OUT_CH, tile_L)
    o_ref[...] = o.astype(o_ref.dtype)


# ------------------------------- host-side glue --------------------------------
def weight_norm_effective(v, g):
    """PyTorch weight_norm: w = g * v / ||v||, norm per output channel (dim 0).

    v : (out, in)  (trailing kernel_size=1 conv dim squeezed), g : (out,)
    """
    norm = jnp.sqrt(jnp.sum(v * v, axis=1, keepdims=True))
    return (g[:, None] / norm) * v


def kernelnet_forward(x_ncw, params, *, omega_0=OMEGA_0, max_tile_l=2048):
    """x_ncw: (B, IN_CH, L) float32 — NCW, matching torch Conv1d convention.

    Returns (B, OUT_CH, L), also NCW, with no host-side transposes.
    """
    B, C, L = x_ncw.shape
    assert C == IN_CH == 1

    # Effective (weight-normalized) weights, omega_0 folded into layers 1 & 2.
    w1 = weight_norm_effective(params["v1"], params["g1"]) * omega_0  # (HID, 1)
    w2 = weight_norm_effective(params["v2"], params["g2"]) * omega_0  # (HID, HID)
    w3 = weight_norm_effective(params["v3"], params["g3"])            # (OUT_CH, HID)
    b1 = (params["b1"] * omega_0)[:, None]                            # (HID, 1)
    b2 = (params["b2"] * omega_0)[:, None]                            # (HID, 1)
    b3 = params["b3"][:, None]                                        # (OUT_CH, 1)

    # Position tiling: lane-dense multiples of 128, pad L if needed.
    tile_l = min(max_tile_l, _round_up(L, 128))
    l_pad = _round_up(L, tile_l)
    x = x_ncw
    if l_pad != L:
        x = jnp.pad(x_ncw, ((0, 0), (0, 0), (0, l_pad - L)))

    grid = (B, l_pad // tile_l)
    out = pl.pallas_call(
        kernelnet_kernel,
        out_shape=jax.ShapeDtypeStruct((B, OUT_CH, l_pad), x.dtype),
        grid_spec=pltpu.PrefetchScalarGridSpec(
            num_scalar_prefetch=0,
            grid=grid,
            in_specs=[
                # x tile: squeeze the batch dim, keep (1, tile_l) in kernel.
                pl.BlockSpec((None, 1, tile_l), lambda b, l: (b, 0, l)),
                pl.BlockSpec((HID, 1), lambda b, l: (0, 0)),        # w1
                pl.BlockSpec((HID, 1), lambda b, l: (0, 0)),        # b1
                pl.BlockSpec((HID, HID), lambda b, l: (0, 0)),      # w2
                pl.BlockSpec((HID, 1), lambda b, l: (0, 0)),        # b2
                pl.BlockSpec((OUT_CH, HID), lambda b, l: (0, 0)),   # w3
                pl.BlockSpec((OUT_CH, 1), lambda b, l: (0, 0)),     # b3
            ],
            out_specs=pl.BlockSpec((None, OUT_CH, tile_l),
                                   lambda b, l: (b, 0, l)),
        ),
        compiler_params=pltpu.CompilerParams(
            dimension_semantics=("parallel", "parallel")),
    )(x, w1, b1, w2, b2, w3, b3)

    if l_pad != L:
        out = out[:, :, :L]
    return out


def kernelnet_ref(x_ncw, params, *, omega_0=OMEGA_0):
    """Pure-JAX reference of the same forward pass (for validation), NCW layout."""
    w1 = weight_norm_effective(params["v1"], params["g1"])
    w2 = weight_norm_effective(params["v2"], params["g2"])
    w3 = weight_norm_effective(params["v3"], params["g3"])
    h = jnp.einsum("oi,bil->bol", w1, x_ncw) + params["b1"][None, :, None]
    h = jnp.sin(omega_0 * h)
    h = jnp.einsum("oi,bil->bol", w2, h) + params["b2"][None, :, None]
    h = jnp.sin(omega_0 * h)
    o = jnp.einsum("oi,bil->bol", w3, h) + params["b3"][None, :, None]
    return o


def init_params(key, *, omega_0=OMEGA_0):
    """Deterministic SIREN-style init (mirrors KernelNet.initialize for is_siren).

    Layer 1 weights ~ U(-1, 1); deeper layers ~ U(+-sqrt(6/fan_in)/omega_0);
    biases ~ U(-1, 1); weight_norm gains g are a synthetic perturbation so the
    g*v/||v|| path is exercised non-trivially.
    """
    ks = jax.random.split(key, 9)
    bnd2 = math.sqrt(6.0 / HID) / omega_0
    v1 = jax.random.uniform(ks[0], (HID, IN_CH), jnp.float32, -1.0, 1.0)
    v2 = jax.random.uniform(ks[1], (HID, HID), jnp.float32, -bnd2, bnd2)
    v3 = jax.random.uniform(ks[2], (OUT_CH, HID), jnp.float32, -bnd2, bnd2)
    b1 = jax.random.uniform(ks[3], (HID,), jnp.float32, -1.0, 1.0)
    b2 = jax.random.uniform(ks[4], (HID,), jnp.float32, -1.0, 1.0)
    b3 = jax.random.uniform(ks[5], (OUT_CH,), jnp.float32, -1.0, 1.0)
    g1 = jax.random.uniform(ks[6], (HID,), jnp.float32, 0.5, 1.5)
    g2 = jax.random.uniform(ks[7], (HID,), jnp.float32, 0.5, 1.5)
    g3 = jax.random.uniform(ks[8], (OUT_CH,), jnp.float32, 0.5, 1.5)
    return dict(v1=v1, g1=g1, b1=b1, v2=v2, g2=g2, b2=b2, v3=v3, g3=g3, b3=b3)


if __name__ == "__main__":
    key = jax.random.PRNGKey(0)
    k_x, k_p = jax.random.split(key)

    # relative positions in [-1, 1]: (batch=2, in_channels=1, length=128) NCW
    B, L = 2, 128
    x = jax.random.uniform(k_x, (B, IN_CH, L), jnp.float32, -1.0, 1.0)
    params = init_params(k_p)

    out = kernelnet_forward(x, params)
    out = jax.block_until_ready(out)

    ref = kernelnet_ref(x, params)
    assert out.shape == (B, OUT_CH, L), out.shape
    assert jnp.allclose(out, ref, rtol=2e-2, atol=2e-2), (
        float(jnp.max(jnp.abs(out - ref))))

    print("KERNEL_OK")
</pallas_src>

<mosaic_0001>
module attributes {stable_mosaic.version = 11 : i64} {
  func.func @kernelnet_kernel(%arg0: i32, %arg1: i32, %arg2: memref<1x1x128xf32, #tpu.memory_space<vmem>>, %arg3: memref<32x1xf32, #tpu.memory_space<vmem>>, %arg4: memref<32x1xf32, #tpu.memory_space<vmem>>, %arg5: memref<32x32xf32, #tpu.memory_space<vmem>>, %arg6: memref<32x1xf32, #tpu.memory_space<vmem>>, %arg7: memref<16x32xf32, #tpu.memory_space<vmem>>, %arg8: memref<16x1xf32, #tpu.memory_space<vmem>>, %arg9: memref<1x16x128xf32, #tpu.memory_space<vmem>>) attributes {dimension_semantics = [#tpu.dimension_semantics<parallel>, #tpu.dimension_semantics<parallel>], iteration_bounds = array<i64: 2, 1>, scalar_prefetch = 0 : i64, scratch_operands = 0 : i64, tpu.core_type = #tpu.core_type<tc>, window_params = [{transform_indices = @transform_0, window_bounds = array<i64: 1, 1, 128>}, {pipeline_mode = #tpu.pipeline_mode<synchronous>, transform_indices = @transform_1, window_bounds = array<i64: 32, 1>}, {pipeline_mode = #tpu.pipeline_mode<synchronous>, transform_indices = @transform_2, window_bounds = array<i64: 32, 1>}, {pipeline_mode = #tpu.pipeline_mode<synchronous>, transform_indices = @transform_3, window_bounds = array<i64: 32, 32>}, {pipeline_mode = #tpu.pipeline_mode<synchronous>, transform_indices = @transform_4, window_bounds = array<i64: 32, 1>}, {pipeline_mode = #tpu.pipeline_mode<synchronous>, transform_indices = @transform_5, window_bounds = array<i64: 16, 32>}, {pipeline_mode = #tpu.pipeline_mode<synchronous>, transform_indices = @transform_6, window_bounds = array<i64: 16, 1>}, {transform_indices = @transform_7, window_bounds = array<i64: 1, 16, 128>}]} {
    %c0 = arith.constant 0 : index
    %c0_0 = arith.constant 0 : index
    %c0_1 = arith.constant 0 : index
    %0 = vector.load %arg2[%c0, %c0_0, %c0_1] : memref<1x1x128xf32, #tpu.memory_space<vmem>>, vector<1x1x128xf32>
    %1 = vector.shape_cast %0 : vector<1x1x128xf32> to vector<1x128xf32>
    %c0_2 = arith.constant 0 : index
    %c0_3 = arith.constant 0 : index
    %2 = vector.load %arg3[%c0_2, %c0_3] : memref<32x1xf32, #tpu.memory_space<vmem>>, vector<32x1xf32>
    %3 = vector.broadcast %2 : vector<32x1xf32> to vector<32x128xf32>
    %4 = vector.broadcast %1 : vector<1x128xf32> to vector<32x128xf32>
    %5 = arith.mulf %3, %4 : vector<32x128xf32>
    %c0_4 = arith.constant 0 : index
    %c0_5 = arith.constant 0 : index
    %6 = vector.load %arg4[%c0_4, %c0_5] : memref<32x1xf32, #tpu.memory_space<vmem>>, vector<32x1xf32>
    %7 = vector.broadcast %6 : vector<32x1xf32> to vector<32x128xf32>
    %8 = arith.addf %5, %7 : vector<32x128xf32>
    %9 = math.sin %8 : vector<32x128xf32>
    %c0_6 = arith.constant 0 : index
    %c0_7 = arith.constant 0 : index
    %10 = vector.load %arg5[%c0_6, %c0_7] : memref<32x32xf32, #tpu.memory_space<vmem>>, vector<32x32xf32>
    %cst = arith.constant dense<0.000000e+00> : vector<32x128xf32>
    %11 = tpu.matmul %10, %9, %cst {dimension_numbers = #tpu.dot_dimension_numbers<[1], [0], [0], [1], [0, 0, 1, 1], [], []>} : vector<32x32xf32>, vector<32x128xf32>, vector<32x128xf32> -> vector<32x128xf32>
    %c0_8 = arith.constant 0 : index
    %c0_9 = arith.constant 0 : index
    %12 = vector.load %arg6[%c0_8, %c0_9] : memref<32x1xf32, #tpu.memory_space<vmem>>, vector<32x1xf32>
    %13 = vector.broadcast %12 : vector<32x1xf32> to vector<32x128xf32>
    %14 = arith.addf %11, %13 : vector<32x128xf32>
    %15 = math.sin %14 : vector<32x128xf32>
    %c0_10 = arith.constant 0 : index
    %c0_11 = arith.constant 0 : index
    %16 = vector.load %arg7[%c0_10, %c0_11] : memref<16x32xf32, #tpu.memory_space<vmem>>, vector<16x32xf32>
    %cst_12 = arith.constant dense<0.000000e+00> : vector<16x128xf32>
    %17 = tpu.matmul %16, %15, %cst_12 {dimension_numbers = #tpu.dot_dimension_numbers<[1], [0], [0], [1], [0, 0, 1, 1], [], []>} : vector<16x32xf32>, vector<32x128xf32>, vector<16x128xf32> -> vector<16x128xf32>
    %c0_13 = arith.constant 0 : index
    %c0_14 = arith.constant 0 : index
    %18 = vector.load %arg8[%c0_13, %c0_14] : memref<16x1xf32, #tpu.memory_space<vmem>>, vector<16x1xf32>
    %19 = vector.broadcast %18 : vector<16x1xf32> to vector<16x128xf32>
    %20 = arith.addf %17, %19 : vector<16x128xf32>
    %c0_15 = arith.constant 0 : index
    %c0_16 = arith.constant 0 : index
    %c0_17 = arith.constant 0 : index
    %21 = vector.load %arg9[%c0_15, %c0_16, %c0_17] : memref<1x16x128xf32, #tpu.memory_space<vmem>>, vector<1x16x128xf32>
    %22 = vector.shape_cast %21 : vector<1x16x128xf32> to vector<16x128xf32>
    %23 = vector.shape_cast %20 : vector<16x128xf32> to vector<1x16x128xf32>
    tpu.vector_store %arg9[%c0_15, %c0_16, %c0_17], %23 {strides = array<i32>} : memref<1x16x128xf32, #tpu.memory_space<vmem>>, vector<1x16x128xf32>,
    return
  }
  func.func @transform_0(%arg0: i32, %arg1: i32) -> (i32, i32, i32) {
    %c0_i32 = arith.constant 0 : i32
    %c0_i32_0 = arith.constant 0 : i32
    return %arg0, %c0_i32, %arg1 : i32, i32, i32
  }
  func.func @transform_1(%arg0: i32, %arg1: i32) -> (i32, i32) {
    %c0_i32 = arith.constant 0 : i32
    %c0_i32_0 = arith.constant 0 : i32
    %c0_i32_1 = arith.constant 0 : i32
    return %c0_i32, %c0_i32_0 : i32, i32
  }
  func.func @transform_2(%arg0: i32, %arg1: i32) -> (i32, i32) {
    %c0_i32 = arith.constant 0 : i32
    %c0_i32_0 = arith.constant 0 : i32
    %c0_i32_1 = arith.constant 0 : i32
    return %c0_i32, %c0_i32_0 : i32, i32
  }
  func.func @transform_3(%arg0: i32, %arg1: i32) -> (i32, i32) {
    %c0_i32 = arith.constant 0 : i32
    %c0_i32_0 = arith.constant 0 : i32
    %c0_i32_1 = arith.constant 0 : i32
    return %c0_i32, %c0_i32_0 : i32, i32
  }
  func.func @transform_4(%arg0: i32, %arg1: i32) -> (i32, i32) {
    %c0_i32 = arith.constant 0 : i32
    %c0_i32_0 = arith.constant 0 : i32
    %c0_i32_1 = arith.constant 0 : i32
    return %c0_i32, %c0_i32_0 : i32, i32
  }
  func.func @transform_5(%arg0: i32, %arg1: i32) -> (i32, i32) {
    %c0_i32 = arith.constant 0 : i32
    %c0_i32_0 = arith.constant 0 : i32
    %c0_i32_1 = arith.constant 0 : i32
    return %c0_i32, %c0_i32_0 : i32, i32
  }
  func.func @transform_6(%arg0: i32, %arg1: i32) -> (i32, i32) {
    %c0_i32 = arith.constant 0 : i32
    %c0_i32_0 = arith.constant 0 : i32
    %c0_i32_1 = arith.constant 0 : i32
    return %c0_i32, %c0_i32_0 : i32, i32
  }
  func.func @transform_7(%arg0: i32, %arg1: i32) -> (i32, i32, i32) {
    %c0_i32 = arith.constant 0 : i32
    %c0_i32_0 = arith.constant 0 : i32
    return %arg0, %c0_i32, %arg1 : i32, i32, i32
  }
}

</mosaic_0001>

<bundles_post_ra>
// kernel: tpu_custom_call.1
= control target key start
LH: loop header
LB: loop body
LE: loop exit
PB: predicated region body
PF: predicated region fallthrough
CT: control target
= control target key end

     0   :  { %12 = vsyncpa [#allocation3], 0  ;;  %s2692_s0 = inlined_call_operand.vmem [shape: f32[2,1,128], index: 0, kind: input, shape index: {}]   ;;  %s2693_s1 = inlined_call_operand.vmem [shape: f32[32,1], index: 1, kind: input, shape index: {}]   ;;  %s2694_s2 = inlined_call_operand.vmem [shape: f32[32,1], index: 2, kind: input, shape index: {}]   ;;  %s2695_s3 = inlined_call_operand.vmem [shape: f32[32,32], index: 3, kind: input, shape index: {}]   ;;  %s2696_s4 = inlined_call_operand.vmem [shape: f32[32,1], index: 4, kind: input, shape index: {}]   ;;  %s2697_s5 = inlined_call_operand.vmem [shape: f32[16,32], index: 5, kind: input, shape index: {}]   ;;  %s2698_s6 = inlined_call_operand.vmem [shape: f32[16,1], index: 6, kind: input, shape index: {}]   ;;  %s2699_s7 = inlined_call_operand.hbm [shape: f32[2,16,128], index: 7, kind: output, shape index: {}]  }
   0x1   :  { %14 = vsyncpa [#allocation3 + $0x1], 0  ;;  %s1867_s24 = smov 0   ;;  %s1869_s25 = smov 0  }
   0x2   :  { %s1871_s26 = smov 0   ;;  %s1873_s27 = smov 0  }
   0x3   :  { %s1875_s28 = smov 0   ;;  %s1877_s29 = smov 0  }
   0x4 LB: > { %s1501_s30 = sadd.s32 4294967295, %s1815_s29   ;;  %s1502_s8 = sadd.s32 4294967294, %s1815_s29   ;;  %s1815_s29 = sphi %s1877_s29, %s20_s29   ;;  %s1811_s28 = sphi %s1875_s28, %s2718_s28   ;;  %s1807_s27 = sphi %s1873_s27, %s2717_s27   ;;  %s1803_s26 = sphi %s1871_s26, %s2716_s26   ;;  %s1799_s25 = sphi %s1869_s25, %s2715_s25   ;;  %s1795_s24 = sphi %s1867_s24, %s2714_s24  }
   0x5   : > { %s32_s9 = sadd.s32 1, %s1811_s28  ;;  %s195_s10 = sadd.s32 1, %s1803_s26 }
   0x6   : > { %p34_p0 = scmp.ge.s32.totalorder %s32_s9, 2  ;;  %p205_p1 = scmp.ne.s32.totalorder %s1803_s26, %s1799_s25 }
   0x7   : > { %p206_p2 = scmp.eq.s32.totalorder %s1501_s30, 1  ;;  %p211_p3 = scmp.ne.s32.totalorder %s1799_s25, %s1795_s24 }
   0x8   : > { %s2720_s9 = smov (%p34_p0, %s32_s9), 0  ;;  %p212_p5 = scmp.eq.s32.totalorder %s1502_s8, 1 }
   0x9   : > { %p1907_p4 = por %p206_p2, %p205_p1  ;;  %s190_s12 = ssub.s32 %s1811_s28, %s2720_s9 }
   0xa   : > { %p1505_p6 = scmp.ge.s32.totalorder %s1815_s29, 1  ;;  %p193_p7 = scmp.eq.s32.totalorder %s190_s12, 0 }
   0xb   : > { %p1914_p8 = por %p212_p5, %p211_p3  ;;  %p257_p9 = scmp.lt.s32.totalorder %s1815_s29, 3 }
   0xc   : > { %s1920_s14 = scalar_select %p193_p7, %s1803_s26, %s195_s10  }
   0xd   : > { %p258_p10 = pnand %p1505_p6, %p257_p9 }
   0xe   : > { %v331_v0 = vld [vmem:[%s2694_s2] sm:$0xff] (!%p258_p10)  ;;  %v1817_v2 = vmov (!%p258_p10), 0   ;;  %v332_v3 = vld [vmem:[%s2694_s2 + $0x8] sm:$0xff] (!%p258_p10)  ;;  %v300_v5 = vld [vmem:[%s2693_s1 + $0x18] sm:$0xff] (!%p258_p10)  ;;  %p290_p11 = scmp.lt.s32.totalorder (!%p258_p10), %s1807_s27, 1  ;;  %s1551_s30 = sshll.u32 (!%p258_p10), %s1807_s27, 8 }
   0xf   : > { %261 = sbr.rel (%p258_p10) target bundleno = 859 (0x35b), region = 48  ;;  %v297_v1 = vld [vmem:[%s2693_s1] sm:$0xff] (!%p258_p10)  ;;  %1704 = vset.pattern.permute.xlu1 (!%p258_p10), %v1817_v2  ;;  %1703 = vset.pattern.permute.xlu0 (!%p258_p10), %v1817_v2  ;;  %v298_v4 = vld [vmem:[%s2693_s1 + $0x8] sm:$0xff] (!%p258_p10)  ;;  %v299_v6 = vld [vmem:[%s2693_s1 + $0x10] sm:$0xff] (!%p258_p10)  ;;  %v1818_v49 = vmov (!%p258_p10), 920167782   ;;  %s2644_s12 = scalar_lea.hbm (!%p258_p10), %s2699_s7, %s1551_s30 }
  0x10   : > { %337 = vperm.xlu1 (!%p258_p10), %1704, %v331_v0   ;;  %303 = vperm.xlu0 (!%p258_p10), %1703, %v297_v1   ;;  %v334_v7 = vld [vmem:[%s2694_s2 + $0x18] sm:$0xff] (!%p258_p10)  ;;  %v333_v8 = vld [vmem:[%s2694_s2 + $0x10] sm:$0xff] (!%p258_p10)  ;;  %v780_v9 = vld [vmem:[%s2696_s4 + $0x8] sm:$0xff] (!%p258_p10)  ;;  %v1819_v57 = vmov (!%p258_p10), 2102212464   ;;  %s1824_s16 = smov (!%p258_p10), [#allocation2]  }
  0x11   : > { %v779_v10 = vld [vmem:[%s2696_s4] sm:$0xff] (!%p258_p10)  ;;  %v782_v11 = vld [vmem:[%s2696_s4 + $0x18] sm:$0xff] (!%p258_p10)  ;;  %v781_v12 = vld [vmem:[%s2696_s4 + $0x10] sm:$0xff] (!%p258_p10)  ;;  %v1820_v59 = vmov (!%p258_p10), 1326507024  }
  0x12   : > { %v1320_v13 = vld [vmem:[%s2698_s6 + $0x8] sm:$0xff] (!%p258_p10)  ;;  %v1319_v14 = vld [vmem:[%s2698_s6] sm:$0xff] (!%p258_p10) }
  0x14   : > { %342 = vperm.xlu1 (!%p258_p10), %1704, %v332_v3   ;;  %308 = vperm.xlu0 (!%p258_p10), %1703, %v298_v4  }
  0x16   : > { %s291_s17 = scalar_select %p290_p11, %s1807_s27, 1 }
  0x18   : > { %318 = vperm.xlu1 %1704, %v300_v5   ;;  %313 = vperm.xlu0 %1703, %v299_v6   ;;  %s295_s20 = scalar_lea.vmem %s2692_s0, %s291_s17  ;;  %s1741_s17 = sshll.u32 %s1824_s16, 4  ;;  %s1742_s17 = int_to_ptr.vmem [resolvable:$false] %s1741_s17 }
  0x19   : > { %v1507_v15 = vld [vmem:[%s295_s20] ss:$0 sm:$0xff]  ;;  %s287_s20 = sand.u32 1, %s1799_s25   ;;  %s1743_s18 = scalar_lea.vmem %s1742_s17, 512 }
  0x1a   : > { %s1506_s21 = sshll.u32 %s287_s20, 4  ;;  %s2646_s15 = scalar_lea.sflag [#allocation3], %s287_s20 }
  0x1b   : > { %s289_s22 = scalar_lea.vmem [#allocation2], %s1506_s21 }
  0x1c   : > { %352 = vperm.xlu1 %1704, %v334_v7   ;;  %347 = vperm.xlu0 %1703, %v333_v8   ;;  %s1429_s23 = sshll.u32 %s289_s22, 4  ;;  %s2639_s23 = int_to_ptr.vmem [resolvable:$true] %s1429_s23 }
  0x1d   : > { %s1737_s27 = scalar_lea.vmem %s2639_s23, 256  ;;  %p1744_p1 = scmp.lt.s32.totalorder %s2639_s23, %s1742_s17 }
  0x1e   : > { %p1738_p12 = scmp.ne.s32.totalorder %s2639_s23, %s1737_s27  ;;  %p1745_p2 = scmp.lt.s32.totalorder %s1743_s18, %s1737_s27 }
  0x20   : > { %790 = vperm.xlu1 %1704, %v780_v9   ;;  %785 = vperm.xlu0 %1703, %v779_v10   ;;  %p1739_p13 = pnand %p1738_p12, %p1907_p4  ;;  %p1746_p3 = por %p1745_p2, %p1744_p1 }
  0x22   : > { %p1740_p0 = pneg %p1739_p13 }
  0x24   : > { %800 = vperm.xlu1 %1704, %v782_v11   ;;  %795 = vperm.xlu0 %1703, %v781_v12   ;;  %p1747_p5 = pnand %p1746_p3, %p1740_p0 }
  0x28   : > { %1328 = vperm.xlu1 %1704, %v1320_v13   ;;  %1323 = vperm.xlu0 %1703, %v1319_v14  }
  0x8f   : > { %v338_v16 = vpop.permute.xlu1 %337  ;;  %v304_v17 = vpop.permute.xlu0 %303 }
  0x90   : > { %v327_v18 = vmul.f32 %v1507_v15, %v304_v17 }
  0x92   : > { %v1969_v19 = vadd.f32 %v338_v16, %v327_v18 }
  0x93   : > { %v343_v20 = vpop.permute.xlu1 %342  ;;  %v309_v21 = vpop.permute.xlu0 %308 }
  0x94   : > { %v362_v22 = vand.u32 2139095040, %v1969_v19  ;;  %v328_v23 = vmul.f32 %v1507_v15, %v309_v21  ;;  %v359_v30 = vand.u32 2147483647, %v1969_v19  ;;  %v1821_v21 = vmov 683565275  }
  0x96   : > { %v363_v24 = vshrl.u32 %v362_v22, 23  ;;  %v1972_v25 = vadd.f32 %v343_v20, %v328_v23  ;;  %v366_v43 = vand.u32 8388607, %v359_v30  ;;  %v1822_v23 = vmov 2475754826  }
  0x97   : > { %v319_v26 = vpop.permute.xlu1 %318  ;;  %v314_v27 = vpop.permute.xlu0 %313 }
  0x98   : > { %v1508_v28 = vadd.s32 4294967169, %v363_v24  ;;  %v466_v29 = vand.u32 2139095040, %v1972_v25  ;;  %v330_v33 = vmul.f32 %v1507_v15, %v319_v26  ;;  %v329_v34 = vmul.f32 %v1507_v15, %v314_v27 }
  0x99   : > { %v367_v52 = vor.u32 8388608, %v366_v43  ;;  %v463_v56 = vand.u32 2147483647, %v1972_v25 }
  0x9a   : > { %v369_v31 = vadd.s32 1, %v1508_v28  ;;  %v467_v32 = vshrl.u32 %v466_v29, 23 }
  0x9b   : > { %v353_v35 = vpop.permute.xlu1 %352  ;;  %v348_v36 = vpop.permute.xlu0 %347  ;;  %v2014_v3 = vshll.u32 %v367_v52, 8  ;;  %v2018_v7 = vand.u32 8388607, %v463_v56 }
  0x9c   : > { %vm370_vm0 = vcmp.gt.s32.totalorder %v369_v31, 0  ;;  %v1512_v37 = vadd.s32 4294967169, %v467_v32  ;;  %v1976_v38 = vadd.f32 %v353_v35, %v330_v33  ;;  %v1978_v39 = vadd.f32 %v348_v36, %v329_v34 }
  0x9d   : > { %v371_v40 = vsel %vm370_vm0, %v369_v31, 0  ;;  %v1823_v31 = vmov 2131351028  }
  0x9e   : > { %v1980_v41 = vand.u32 31, %v371_v40  ;;  %v473_v42 = vadd.s32 1, %v1512_v37  ;;  %v671_v44 = vand.u32 2147483647, %v1976_v38  ;;  %v674_v45 = vand.u32 2139095040, %v1976_v38 }
  0x9f   : > { %v567_v47 = vand.u32 2147483647, %v1978_v39  ;;  %v1992_v53 = vshrl.u32 %v371_v40, 5  ;;  %v570_v61 = vand.u32 2139095040, %v1978_v39 }
  0xa0   : > { %v1987_v46 = vsub.s32 32, %v1980_v41  ;;  %vm474_vm1 = vcmp.gt.s32.totalorder %v473_v42, 0  ;;  %v675_v48 = vshrl.u32 %v674_v45, 23  ;;  %v678_v55 = vand.u32 8388607, %v671_v44 }
  0xa1   : > { %v475_v51 = vsel %vm474_vm1, %v473_v42, 0  ;;  %v385_v58 = vshll.u32 %v1819_v57, %v1980_v41  ;;  %v574_v62 = vand.u32 8388607, %v567_v47  ;;  %v2012_v1 = vshll.u32 %v1818_v49, %v1980_v41 }
  0xa2   : > { %v386_v50 = vshrl.u32 %v1818_v49, %v1987_v46  ;;  %v1520_v54 = vadd.s32 4294967169, %v675_v48  ;;  %v2001_v60 = vshrl.u32 %v1820_v59, %v1987_v46  ;;  %v2006_v63 = vand.u32 31, %v475_v51 }
  0xa3   : > { %v679_v4 = vor.u32 8388608, %v678_v55  ;;  %v571_v5 = vshrl.u32 %v570_v61, 23  ;;  %v575_v6 = vor.u32 8388608, %v574_v62  ;;  %vm394_vm2 = vcmp.lt.s32.totalorder %v1992_v53, 4 }
  0xa4   : > { %v2008_v0 = vor.u32 %v386_v50, %v385_v58  ;;  %v681_v2 = vadd.s32 1, %v1520_v54  ;;  %v390_v8 = vor.u32 %v2001_v60, %v2012_v1  ;;  %v2023_v9 = vshrl.u32 %v475_v51, 5 }
  0xa5   : > { %v2026_v10 = vsub.s32 32, %v2006_v63  ;;  %v2030_v11 = vshll.u32 %v1819_v57, %v2006_v63  ;;  %v1516_v13 = vadd.s32 4294967169, %v571_v5  ;;  %v2039_v15 = vshll.u32 %v1818_v49, %v2006_v63 }
  0xa6   : > { %vm682_vm3 = vcmp.gt.s32.totalorder %v681_v2, 0  ;;  %v2035_v14 = vsel %vm394_vm2, %v2008_v0, 920167782  ;;  %v2041_v18 = vshll.u32 %v679_v4, 8  ;;  %v2043_v20 = vshll.u32 %v575_v6, 8 }
  0xa7   : > { %v683_v12 = vsel %vm682_vm3, %v681_v2, 0  ;;  %v376_v22 = vshll.u32 %v1821_v21, %v1980_v41  ;;  %v377_v24 = vshrl.u32 %v1822_v23, %v1987_v46  ;;  %v577_v29 = vadd.s32 1, %v1516_v13 }
  0xa8   : > { %v684_v16 = vshrl.u32 %v683_v12, 5  ;;  %v685_v17 = vand.u32 31, %v683_v12  ;;  %vm391_vm14 = vcmp.lt.s32.totalorder %v1992_v53, 1  ;;  %vm392_vm15 = vcmp.lt.s32.totalorder %v1992_v53, 2 }
  0xa9   : > { %vm578_vm7 = vcmp.gt.s32.totalorder %v577_v29, 0  ;;  %vm393_vm0 = vcmp.lt.s32.totalorder %v1992_v53, 3  ;;  %v483_v53 = vshll.u32 %v1822_v23, %v2006_v63 }
  0xaa   : > { %v686_v26 = vsub.s32 32, %v685_v17  ;;  %v688_v27 = vshll.u32 %v1821_v21, %v685_v17  ;;  %v691_v28 = vshll.u32 %v1822_v23, %v685_v17  ;;  %v694_v32 = vshll.u32 %v1823_v31, %v685_v17 }
  0xab   : > { %v697_v33 = vshll.u32 %v1819_v57, %v685_v17  ;;  %v700_v34 = vshll.u32 %v1818_v49, %v685_v17  ;;  %vm703_vm4 = vcmp.lt.s32.totalorder %v684_v16, 1  ;;  %vm704_vm5 = vcmp.lt.s32.totalorder %v684_v16, 2 }
  0xac   : > { %v689_v35 = vshrl.u32 %v1822_v23, %v686_v26  ;;  %v692_v36 = vshrl.u32 %v1823_v31, %v686_v26  ;;  %v695_v37 = vshrl.u32 %v1819_v57, %v686_v26  ;;  %v687_v40 = vshrl.u32 %v1821_v21, %v686_v26 }
  0xad   : > { %v698_v42 = vshrl.u32 %v1818_v49, %v686_v26  ;;  %v701_v43 = vshrl.u32 %v1820_v59, %v686_v26  ;;  %vm705_vm6 = vcmp.lt.s32.totalorder %v684_v16, 3  ;;  %vm706_vm8 = vcmp.lt.s32.totalorder %v684_v16, 4 }
  0xae   : > { %v690_v45 = vor.u32 %v689_v35, %v688_v27  ;;  %v693_v48 = vor.u32 %v692_v36, %v691_v28  ;;  %v696_v50 = vor.u32 %v695_v37, %v694_v32  ;;  %v579_v54 = vsel %vm578_vm7, %v577_v29, 0 }
  0xaf   : > { %v699_v51 = vor.u32 %v698_v42, %v697_v33  ;;  %v702_v52 = vor.u32 %v701_v43, %v700_v34  ;;  %v580_v6 = vshrl.u32 %v579_v54, 5  ;;  %v581_v26 = vand.u32 31, %v579_v54 }
  0xb0   : > { %v707_v55 = vsel %vm703_vm4, %v687_v40, %v690_v45  ;;  %v708_v58 = vsel %vm706_vm8, %v696_v50, 2102212464  ;;  %v711_v61 = vsel %vm703_vm4, %v690_v45, %v693_v48  ;;  %v715_v62 = vsel %vm703_vm4, %v693_v48, %v696_v50 }
  0xb1   : > { %v709_v2 = vsel %vm705_vm6, %v693_v48, %v708_v58  ;;  %v712_v4 = vsel %vm706_vm8, %v699_v51, 920167782  ;;  %v716_v5 = vsel %vm706_vm8, %v702_v52, 1326507024  ;;  %v2069_v29 = vor.u32 %v377_v24, %v376_v22 }
  0xb2   : > { %v710_v12 = vsel %vm704_vm5, %v707_v55, %v709_v2  ;;  %v713_v13 = vsel %vm705_vm6, %v696_v50, %v712_v4  ;;  %v717_v17 = vsel %vm705_vm6, %v699_v51, %v716_v5  ;;  %v379_v32 = vshll.u32 %v1822_v23, %v1980_v41 }
  0xb3   : > { %v714_v27 = vsel %vm704_vm5, %v711_v61, %v713_v13  ;;  %v718_v28 = vsel %vm704_vm5, %v715_v62, %v717_v17  ;;  %v726_v37 = vmul.u32 %v2041_v18, %v710_v12  ;;  %v582_v40 = vsub.s32 32, %v581_v26 }
  0xb4   : > { %v2074_v33 = vmul.u32.u64.low %v2041_v18, %v718_v28  ;;  %v2075_v34 = vmul.u32.u64.high %v2041_v18, %v718_v28, %v2074_v33  ;;  %v2078_v35 = vmul.u32.u64.low %v2041_v18, %v714_v27  ;;  %v2079_v36 = vmul.u32.u64.high %v2041_v18, %v714_v27, %v2078_v35 }
  0xb5   : > { %vm599_vm9 = vcmp.lt.s32.totalorder %v580_v6, 1  ;;  %v380_v16 = vshrl.u32 %v1823_v31, %v1987_v46  ;;  %v584_v22 = vshll.u32 %v1821_v21, %v581_v26  ;;  %v587_v24 = vshll.u32 %v1822_v23, %v581_v26 }
  0xb6   : > { %v590_v42 = vshll.u32 %v1823_v31, %v581_v26  ;;  %v593_v43 = vshll.u32 %v1819_v57, %v581_v26  ;;  %v585_v45 = vshrl.u32 %v1822_v23, %v582_v40  ;;  %v588_v48 = vshrl.u32 %v1823_v31, %v582_v40 }
  0xb7   : > { %v591_v50 = vshrl.u32 %v1819_v57, %v582_v40  ;;  %v596_v18 = vshll.u32 %v1818_v49, %v581_v26  ;;  %vm728_vm10 = vc.u32 %v2075_v34, %v2078_v35  ;;  %v729_v51 = vadd.s32 1, %v2079_v36 }
  0xb8   : > { %v583_v52 = vshrl.u32 %v1821_v21, %v582_v40  ;;  %v594_v54 = vshrl.u32 %v1818_v49, %v582_v40  ;;  %v586_v55 = vor.u32 %v585_v45, %v584_v22  ;;  %v589_v58 = vor.u32 %v588_v48, %v587_v24 }
  0xb9   : > { %v592_v61 = vor.u32 %v591_v50, %v590_v42  ;;  %v597_v62 = vshrl.u32 %v1820_v59, %v582_v40  ;;  %v730_v2 = vsel %vm728_vm10, %v729_v51, %v2079_v36  ;;  %vm601_vm11 = vcmp.lt.s32.totalorder %v580_v6, 3 }
  0xba   : > { %v595_v4 = vor.u32 %v594_v54, %v593_v43  ;;  %vm602_vm12 = vcmp.lt.s32.totalorder %v580_v6, 4  ;;  %v731_v5 = vadd.s32 %v730_v2, %v726_v37  ;;  %v603_v13 = vsel %vm599_vm9, %v583_v52, %v586_v55 }
  0xbb   : > { %v598_v12 = vor.u32 %v597_v62, %v596_v18  ;;  %v604_v17 = vsel %vm602_vm12, %v592_v61, 2102212464  ;;  %v607_v27 = vsel %vm599_vm9, %v586_v55, %v589_v58  ;;  %v611_v33 = vsel %vm599_vm9, %v589_v58, %v592_v61 }
  0xbc   : > { %v605_v26 = vsel %vm601_vm11, %v589_v58, %v604_v17  ;;  %v608_v28 = vsel %vm602_vm12, %v595_v4, 920167782  ;;  %v732_v22 = vadd.s32 536870912, %v731_v5  ;;  %vm600_vm13 = vcmp.lt.s32.totalorder %v580_v6, 2 }
  0xbd   : > { %v609_v40 = vsel %vm601_vm11, %v592_v61, %v608_v28  ;;  %v612_v36 = vsel %vm602_vm12, %v598_v12, 1326507024  ;;  %v606_v24 = vsel %vm600_vm13, %v603_v13, %v605_v26  ;;  %v381_v43 = vor.u32 %v380_v16, %v379_v32 }
  0xbe   : > { %v610_v42 = vsel %vm600_vm13, %v607_v27, %v609_v40  ;;  %v613_v37 = vsel %vm601_vm11, %v595_v4, %v612_v36  ;;  %v2106_v45 = vshrl.u32 %v732_v22, 30  ;;  %v382_v54 = vshll.u32 %v1823_v31, %v1980_v41 }
  0xbf   : > { %v614_v48 = vsel %vm600_vm13, %v611_v33, %v613_v37  ;;  %v2109_v50 = vmul.u32.u64.low %v2043_v20, %v610_v42  ;;  %v2110_v18 = vmul.u32.u64.high %v2043_v20, %v610_v42, %v2109_v50  ;;  %v383_v6 = vshrl.u32 %v1819_v57, %v1987_v46 }
  0xc0   : > { %v2114_v51 = vmul.u32.u64.low %v2043_v20, %v614_v48  ;;  %v2115_v52 = vmul.u32.u64.high %v2043_v20, %v614_v48, %v2114_v51  ;;  %v404_v32 = vsel %vm394_vm2, %v390_v8, 1326507024  ;;  %v490_v16 = vshrl.u32 %v1818_v49, %v2026_v10 }
  0xc1   : > { %v734_v55 = vshll.u32 %v2106_v45, 30  ;;  %v622_v58 = vmul.u32 %v2043_v20, %v606_v24  ;;  %v375_v41 = vshrl.u32 %v1821_v21, %v1987_v46  ;;  %v384_v61 = vor.u32 %v383_v6, %v382_v54 }
  0xc2   : > { %v399_v60 = vsel %vm391_vm14, %v2069_v29, %v381_v43  ;;  %v625_v8 = vadd.s32 1, %v2110_v18  ;;  %vm624_vm1 = vc.u32 %v2115_v52, %v2109_v50  ;;  %v405_v62 = vsel %vm393_vm0, %v2008_v0, %v404_v32 }
  0xc3   : > { %v2136_v1 = vsub.s32 %v731_v5, %v734_v55  ;;  %v396_v20 = vsel %vm394_vm2, %v384_v61, 2102212464  ;;  %v401_v46 = vsel %vm393_vm0, %v384_v61, %v2035_v14  ;;  %v493_v2 = vshrl.u32 %v1820_v59, %v2026_v10 }
  0xc4   : > { %v626_v5 = vsel %vm624_vm1, %v625_v8, %v2110_v18  ;;  %v402_v12 = vsel %vm392_vm15, %v399_v60, %v401_v46  ;;  %v395_v17 = vsel %vm391_vm14, %v375_v41, %v2069_v29  ;;  %v397_v26 = vsel %vm393_vm0, %v381_v43, %v396_v20 }
  0xc5   : > { %v737_v4 = vsub.s32 0, %v2136_v1  ;;  %v627_v13 = vadd.s32 %v626_v5, %v622_v58  ;;  %v403_v14 = vsel %vm391_vm14, %v381_v43, %v384_v61  ;;  %v481_v29 = vshrl.u32 %v1822_v23, %v2026_v10 }
  0xc6   : > { %v406_v27 = vsel %vm392_vm15, %v403_v14, %v405_v62  ;;  %v2162_v28 = vmul.u32.u64.low %v2014_v3, %v402_v12  ;;  %v2163_v33 = vmul.u32.u64.high %v2014_v3, %v402_v12, %v2162_v28  ;;  %vm498_vm2 = vcmp.lt.s32.totalorder %v2023_v9, 4 }
  0xc7   : > { %v1521_v0 = vmin.u32 %v737_v4, %v2136_v1  ;;  %v628_v22 = vadd.s32 536870912, %v627_v13  ;;  %v2167_v40 = vmul.u32.u64.low %v2014_v3, %v406_v27  ;;  %v2168_v36 = vmul.u32.u64.high %v2014_v3, %v406_v27, %v2167_v40 }
  0xc8   : > { %v398_v42 = vsel %vm392_vm15, %v395_v17, %v397_v26  ;;  %v484_v37 = vshrl.u32 %v1823_v31, %v2026_v10  ;;  %v491_v43 = vor.u32 %v490_v16, %v2030_v11  ;;  %v480_v18 = vshll.u32 %v1821_v21, %v2006_v63 }
  0xc9   : > { %v739_v24 = vclz %v1521_v0  ;;  %v2178_v48 = vshrl.u32 %v628_v22, 30  ;;  %v487_v51 = vshrl.u32 %v1819_v57, %v2026_v10  ;;  %v494_v54 = vor.u32 %v493_v2, %v2039_v15 }
  0xca   : > { %v417_v6 = vadd.s32 1, %v2163_v33  ;;  %v486_v32 = vshll.u32 %v1823_v31, %v2006_v63  ;;  %v414_v16 = vmul.u32 %v2014_v3, %v398_v42  ;;  %vm416_vm3 = vc.u32 %v2168_v36, %v2162_v28 }
  0xcb   : > { %v630_v11 = vshll.u32 %v2178_v48, 30  ;;  %v482_v55 = vor.u32 %v481_v29, %v480_v18  ;;  %v1522_v58 = vadd.s32 4294967294, %v739_v24  ;;  %v485_v15 = vor.u32 %v484_v37, %v483_v53 }
  0xcc   : > { %v418_v41 = vsel %vm416_vm3, %v417_v6, %v2163_v33  ;;  %v488_v61 = vor.u32 %v487_v51, %v486_v32  ;;  %v504_v60 = vsel %vm498_vm2, %v491_v43, 920167782  ;;  %v508_v63 = vsel %vm498_vm2, %v494_v54, 1326507024 }
  0xcd   : > { %v2197_v8 = vsub.s32 %v627_v13, %v630_v11  ;;  %v419_v20 = vadd.s32 %v418_v41, %v414_v16  ;;  %v471_v3 = vor.u32 8388608, %v2018_v7  ;;  %vm495_vm4 = vcmp.lt.s32.totalorder %v2023_v9, 1 }
  0xce   : > { %vm497_vm5 = vcmp.lt.s32.totalorder %v2023_v9, 3  ;;  %vm1523_vm6 = vcmp.lt.s32.totalorder %v1522_v58, 0  ;;  %v503_v2 = vsel %vm495_vm4, %v482_v55, %v485_v15  ;;  %v507_v5 = vsel %vm495_vm4, %v485_v15, %v488_v61 }
  0xcf   : > { %v633_v46 = vsub.s32 0, %v2197_v8  ;;  %v420_v62 = vadd.s32 536870912, %v419_v20  ;;  %v505_v4 = vsel %vm497_vm5, %v488_v61, %v504_v60  ;;  %vm496_vm7 = vcmp.lt.s32.totalorder %v2023_v9, 2 }
  0xd0   : > { %v509_v13 = vsel %vm497_vm5, %v491_v43, %v508_v63  ;;  %v511_v26 = vshll.u32 %v471_v3, 8  ;;  %v742_v14 = vsel %vm1523_vm6, 0, %v1522_v58  ;;  %v506_v33 = vsel %vm496_vm7, %v503_v2, %v505_v4 }
  0xd1   : > { %v1517_v12 = vmin.u32 %v633_v46, %v2197_v8  ;;  %v2212_v7 = vshrl.u32 %v420_v62, 30  ;;  %v510_v17 = vsel %vm496_vm7, %v507_v5, %v509_v13  ;;  %v500_v42 = vsel %vm498_vm2, %v488_v61, 2102212464 }
  0xd2   : > { %v2222_v22 = vmul.u32.u64.low %v511_v26, %v510_v17  ;;  %v2223_v40 = vmul.u32.u64.high %v511_v26, %v510_v17, %v2222_v22  ;;  %v747_v37 = vsub.s32 4294967266, %v742_v14  ;;  %v479_v43 = vshrl.u32 %v1821_v21, %v2026_v10 }
  0xd3   : > { %v635_v0 = vclz %v1517_v12  ;;  %v422_v27 = vshll.u32 %v2212_v7, 30  ;;  %v2229_v18 = vmul.u32.u64.low %v511_v26, %v506_v33  ;;  %v2230_v51 = vmul.u32.u64.high %v511_v26, %v506_v33, %v2229_v18  ;;  %v775_v33 = vld [vmem:[%s2695_s3] sm:$0xff] }
  0xd4   : > { %v499_v53 = vsel %vm495_vm4, %v479_v43, %v482_v55  ;;  %v501_v32 = vsel %vm497_vm5, %v485_v15, %v500_v42  ;;  %v748_v58 = vadd.s32 127, %v747_v37  ;;  %v743_v61 = vsub.s32 32, %v742_v14 }
  0xd5   : > { %v1518_v29 = vadd.s32 4294967294, %v635_v0  ;;  %v423_v24 = vsub.s32 %v419_v20, %v422_v27  ;;  %v521_v41 = vadd.s32 1, %v2230_v51  ;;  %v502_v60 = vsel %vm496_vm7, %v499_v53, %v501_v32 }
  0xd6   : > { %vm520_vm9 = vc.u32 %v2223_v40, %v2229_v18  ;;  %v727_v55 = vadd.s32 %v2078_v35, %v2075_v34  ;;  %v749_v3 = vshll.u32 %v748_v58, 23  ;;  %v518_v46 = vmul.u32 %v511_v26, %v502_v60 }
  0xd7   : > { %vm1519_vm8 = vcmp.lt.s32.totalorder %v1518_v29, 0  ;;  %v425_v54 = vsub.s32 0, %v423_v24  ;;  %v522_v62 = vsel %vm520_vm9, %v521_v41, %v2230_v51  ;;  %v623_v4 = vadd.s32 %v2109_v50, %v2115_v52 }
  0xd8   : > { %v638_v6 = vsel %vm1519_vm8, 0, %v1518_v29  ;;  %v745_v2 = vshrl.u32 %v727_v55, %v743_v61  ;;  %v523_v12 = vadd.s32 %v522_v62, %v518_v46  ;;  %v744_v13 = vshll.u32 %v2136_v1, %v742_v14 }
  0xd9   : > { %v643_v11 = vsub.s32 4294967266, %v638_v6  ;;  %v1509_v16 = vmin.u32 %v425_v54, %v423_v24  ;;  %v639_v15 = vsub.s32 32, %v638_v6  ;;  %v750_v27 = vor.u32 4788187, %v749_v3 }
  0xda   : > { %v415_v35 = vadd.s32 %v2162_v28, %v2168_v36  ;;  %v524_v26 = vadd.s32 536870912, %v523_v12  ;;  %v746_v22 = vor.u32 %v745_v2, %v744_v13  ;;  %v640_v50 = vshll.u32 %v2197_v8, %v638_v6 }
  0xdb   : > { %v427_v10 = vclz %v1509_v16  ;;  %v644_v20 = vadd.s32 127, %v643_v11  ;;  %v641_v34 = vshrl.u32 %v623_v4, %v639_v15  ;;  %vm803_vm11 = vcmask 261120  }
  0xdc   : > { %v2254_v37 = vshrl.u32 %v524_v26, 30  ;;  %1574 = vmatprep.mubr.msk.f32.mxu0 %vm803_vm11, %v775_v33  ;;  %v751_v14 = vand.u32 2147483647, %v750_v27  ;;  %v753_v54 = vcvt.s32.f32 %v746_v22  ;;  %vm673_vm12 = vcmp.lt.s32.totalorder %v1976_v38, 0 }
  0xdd   : > { %v1510_v63 = vadd.s32 4294967294, %v427_v10  ;;  %v645_v9 = vshll.u32 %v644_v20, 23  ;;  %v642_v43 = vor.u32 %v641_v34, %v640_v50  ;;  %vm2263_vm14 = vcmp.le.f32.partialorder %v671_v44, 0.7853982 }
  0xde   : > { %v526_v36 = vshll.u32 %v2254_v37, 30  ;;  %v754_v8 = vmul.f32 %v753_v54, %v751_v14  ;;  %vm569_vm15 = vcmp.lt.s32.totalorder %v1978_v39, 0  ;;  %v519_v4 = vadd.s32 %v2229_v18, %v2223_v40 }
  0xdf   : > { %vm1511_vm10 = vcmp.lt.s32.totalorder %v1510_v63, 0  ;;  %v646_v29 = vor.u32 4788187, %v645_v9  ;;  %v649_v6 = vcvt.s32.f32 %v642_v43  ;;  %vm2277_vm0 = vcmp.le.f32.partialorder %v567_v47, 0.7853982 }
  0xe0   : > { %v430_v5 = vsel %vm1511_vm10, 0, %v1510_v63  ;;  %v527_v11 = vsub.s32 %v523_v12, %v526_v36  ;;  %v755_v60 = vxor.u32 2147483648, %v754_v8  ;;  %vm361_vm1 = vcmp.lt.s32.totalorder %v1969_v19, 0 }
  0xe1   : > { %v431_v17 = vsub.s32 32, %v430_v5  ;;  %v435_v0 = vsub.s32 4294967266, %v430_v5  ;;  %v432_v28 = vshll.u32 %v423_v24, %v430_v5  ;;  %v647_v53 = vand.u32 2147483647, %v646_v29 }
  0xe2   : > { %v529_v58 = vsub.s32 0, %v527_v11  ;;  %v756_v24 = vsel %vm673_vm12, %v755_v60, %v754_v8  ;;  %vm2289_vm2 = vcmp.le.f32.partialorder %v359_v30, 0.7853982  ;;  %v757_v33 = vsub.s32 4, %v2106_v45 }
  0xe3   : > { %v436_v52 = vadd.s32 127, %v435_v0  ;;  %v433_v42 = vshrl.u32 %v415_v35, %v431_v17  ;;  %v650_v41 = vmul.f32 %v649_v6, %v647_v53  ;;  %v759_v12 = vsel %vm2263_vm14, %v1976_v38, %v756_v24 }
  0xe4   : > { %v1513_v10 = vmin.u32 %v529_v58, %v527_v11  ;;  %1705 = vcosq.f32 %v759_v12  ;;  %v653_v35 = vsub.s32 4, %v2178_v48  ;;  %v445_v30 = vsub.s32 4, %v2212_v7 }
  0xe5   : > { %v437_v1 = vshll.u32 %v436_v52, 23  ;;  %v434_v32 = vor.u32 %v433_v42, %v432_v28  ;;  %v651_v63 = vxor.u32 2147483648, %v650_v41  ;;  %1707 = vsinq.f32 %v759_v12 }
  0xe6   : > { %v531_v55 = vclz %v1513_v10  ;;  %v654_v29 = vsel %vm569_vm15, %v653_v35, %v2178_v48  ;;  %v549_v42 = vsub.s32 4, %v2254_v37  ;;  %v446_v43 = vsel %vm361_vm1, %v445_v30, %v2212_v7 }
  0xe7   : > { %v438_v51 = vor.u32 4788187, %v437_v1  ;;  %v441_v61 = vcvt.s32.f32 %v434_v32  ;;  %v652_v2 = vsel %vm569_vm15, %v651_v63, %v650_v41  ;;  %v758_v1 = vsel %vm673_vm12, %v757_v33, %v2106_v45 }
  0xe8   : > { %v1514_v3 = vadd.s32 4294967294, %v531_v55  ;;  %v655_v18 = vsel %vm2277_vm0, %v1978_v39, %v652_v2  ;;  %v656_v28 = vsel %vm2277_vm0, 0, %v654_v29  ;;  %vm465_vm3 = vcmp.lt.s32.totalorder %v1972_v25, 0 }
  0xe9   : > { %v439_v16 = vand.u32 2147483647, %v438_v51  ;;  %1709 = vcosq.f32 %v655_v18  ;;  %v760_v48 = vsel %vm2263_vm14, 0, %v758_v1  ;;  %v550_v51 = vsel %vm465_vm3, %v549_v42, %v2254_v37  ;;  %v786_v42 = vpop.permute.xlu0 %785 }
  0xea   : > { %vm1515_vm13 = vcmp.lt.s32.totalorder %v1514_v3, 0  ;;  %1711 = vsinq.f32 %v655_v18  ;;  %v448_v45 = vsel %vm2289_vm2, 0, %v446_v43  ;;  %vm464_vm4 = vcmp.le.f32.partialorder %v463_v56, 0.7853982 }
  0xeb   : > { %v442_v20 = vmul.f32 %v441_v61, %v439_v16  ;;  %v534_v62 = vsel %vm1515_vm13, 0, %v1514_v3  ;;  %v660_v7 = vadd.s32 3, %v656_v28  ;;  %v764_v8 = vadd.s32 3, %v760_v48 }
  0xec   : > { %v535_v9 = vsub.s32 32, %v534_v62  ;;  %v539_v5 = vsub.s32 4294967266, %v534_v62  ;;  %v536_v17 = vshll.u32 %v527_v11, %v534_v62  ;;  %v552_v16 = vsel %vm464_vm4, 0, %v550_v51 }
  0xed   : > { %v443_v15 = vxor.u32 2147483648, %v442_v20  ;;  %v452_v41 = vadd.s32 3, %v448_v45  ;;  %v661_v61 = vand.u32 3, %v660_v7  ;;  %v556_v60 = vadd.s32 3, %v552_v16 }
  0xee   : > { %v537_v0 = vshrl.u32 %v519_v4, %v535_v9  ;;  %v540_v40 = vadd.s32 127, %v539_v5  ;;  %v1706_v54 = vpop.eup %1705  ;;  %vm659_vm0 = vweird.f32 %v1978_v39  ;;  %v777_v39 = vld [vmem:[%s2695_s3 + $0x10] sm:$0xff] }
  0xef   : > { %v444_v13 = vsel %vm361_vm1, %v443_v15, %v442_v20  ;;  %v1708_v32 = vpop.eup %1707  ;;  %v765_v20 = vand.u32 3, %v764_v8  ;;  %v771_v3 = vxor.u32 2147483648, %v1706_v54  ;;  %v453_v24 = vand.u32 3, %v452_v41 }
  0xf0   : > { %v538_v47 = vor.u32 %v537_v0, %v536_v17  ;;  %v541_v34 = vshll.u32 %v540_v40, 23  ;;  %v447_v26 = vsel %vm2289_vm2, %v1969_v19, %v444_v13  ;;  %v768_v56 = vxor.u32 2147483648, %v1708_v32 }
  0xf1   : > { %1713 = vcosq.f32 %v447_v26  ;;  %vm663_vm5 = vcmp.eq.s32.totalorder %v661_v61, 0  ;;  %v557_v62 = vand.u32 3, %v556_v60  ;;  %vm666_vm6 = vcmp.eq.s32.totalorder %v661_v61, 2 }
  0xf2   : > { %v542_v22 = vor.u32 4788187, %v541_v34  ;;  %v545_v52 = vcvt.s32.f32 %v538_v47  ;;  %1715 = vsinq.f32 %v447_v26  ;;  %vm767_vm7 = vcmp.eq.s32.totalorder %v765_v20, 0 }
  0xf3   : > { %v1710_v6 = vpop.eup %1709  ;;  %vm770_vm8 = vcmp.eq.s32.totalorder %v765_v20, 2  ;;  %v769_v9 = vsel %vm767_vm7, %v1706_v54, %v768_v56  ;;  %vm455_vm9 = vcmp.eq.s32.totalorder %v453_v24, 0  ;;  %vm458_vm10 = vcmp.eq.s32.totalorder %v453_v24, 2 }
  0xf4   : > { %v543_v50 = vand.u32 2147483647, %v542_v22  ;;  %v1712_v58 = vpop.eup %1711  ;;  %v667_v63 = vxor.u32 2147483648, %v1710_v6  ;;  %v772_v5 = vsel %vm770_vm8, %v771_v3, %v1708_v32  ;;  %vm662_vm12 = vcmp.lt.s32.totalorder %v661_v61, 2 }
  0xf5   : > { %v664_v55 = vxor.u32 2147483648, %v1712_v58  ;;  %vm766_vm13 = vcmp.lt.s32.totalorder %v765_v20, 2  ;;  %vm454_vm14 = vcmp.lt.s32.totalorder %v453_v24, 2  ;;  %vm562_vm15 = vcmp.eq.s32.totalorder %v557_v62, 2 }
  0xf6   : > { %v546_v14 = vmul.f32 %v545_v52, %v543_v50  ;;  %v668_v4 = vsel %vm666_vm6, %v667_v63, %v1712_v58  ;;  %v773_v18 = vsel %vm766_vm13, %v769_v9, %v772_v5  ;;  %vm559_vm1 = vcmp.eq.s32.totalorder %v557_v62, 0 }
  0xf7   : > { %v665_v2 = vsel %vm663_vm5, %v1710_v6, %v664_v55  ;;  %vm763_vm2 = vweird.f32 %v1976_v38  ;;  %vm555_vm5 = vweird.f32 %v1972_v25  ;;  %v776_v38 = vld [vmem:[%s2695_s3 + $0x8] sm:$0xff]  ;;  %v796_v6 = vpop.permute.xlu0 %795 }
  0xf8   : > { %v547_v36 = vxor.u32 2147483648, %v546_v14  ;;  %v669_v40 = vsel %vm662_vm12, %v665_v2, %v668_v4  ;;  %v774_v33 = vsel %vm763_vm2, nan, %v773_v18 }
  0xf9   : > { %v670_v26 = vsel %vm659_vm0, nan, %v669_v40 }
  0xfa   : > { %v548_v53 = vsel %vm465_vm3, %v547_v36, %v546_v14  ;;  %vm558_vm3 = vcmp.lt.s32.totalorder %v557_v62, 2  ;;  %v1595_v29 = vpack.c.bf16 %v774_v33, %v670_v26 }
  0xfb   : > { %v551_v11 = vsel %vm464_vm4, %v1972_v25, %v548_v53  ;;  %v1714_v37 = vpop.eup %1713  ;;  %vm451_vm4 = vweird.f32 %v1969_v19  ;;  %v778_v19 = vld [vmem:[%s2695_s3 + $0x18] sm:$0xff]  ;;  %v791_v25 = vpop.permute.xlu1 %790 }
  0xfc   : > { %1717 = vcosq.f32 %v551_v11  ;;  %v1716_v10 = vpop.eup %1715  ;;  %v459_v46 = vxor.u32 2147483648, %v1714_v37 }
  0xfd   : > { %1719 = vsinq.f32 %v551_v11  ;;  %v456_v15 = vxor.u32 2147483648, %v1716_v10 }
  0xfe   : > { %v460_v13 = vsel %vm458_vm10, %v459_v46, %v1716_v10 }
  0xff   : > { %v457_v44 = vsel %vm455_vm9, %v1714_v37, %v456_v15  ;;  %v801_v51 = vpop.permute.xlu1 %800  ;;  %v1317_v15 = vld [vmem:[%s2697_s5] sm:$0xff] }
 0x100   : > { %v461_v47 = vsel %vm454_vm14, %v457_v44, %v460_v13  ;;  %1588 = vmatprep.mubr.msk.f32.mxu1 %vm803_vm11, %v1317_v15 }
 0x101   : > { %v462_v30 = vsel %vm451_vm4, nan, %v461_v47 }
 0x106   : > { %v1718_v12 = vpop.eup %1717 }
 0x107   : > { %v1720_v17 = vpop.eup %1719  ;;  %v563_v0 = vxor.u32 2147483648, %v1718_v12 }
 0x108   : > { %v560_v27 = vxor.u32 2147483648, %v1720_v17 }
 0x109   : > { %v564_v34 = vsel %vm562_vm15, %v563_v0, %v1720_v17 }
 0x10a   : > { %v561_v35 = vsel %vm559_vm1, %v1718_v12, %v560_v27 }
 0x10b   : > { %v565_v22 = vsel %vm558_vm3, %v561_v35, %v564_v34 }
 0x10c   : > { %v566_v50 = vsel %vm555_vm5, nan, %v565_v22 }
 0x10d   : > { %v1591_v52 = vpack.c.bf16 %v566_v50, %v462_v30 }
 0x10f   : > { %1592 = vmatprep.subr.bf16.mxu0 %v1591_v52 }
 0x110   : > { %1594 = vmatpush3.bf16.msra.mxu0 %v1591_v52 }
 0x111   : > { %1596 = vmatprep.subr.bf16.mxu0 %v1595_v29 }
 0x114   : > { %1598 = vmatpush3.bf16.msra.mxu0 %v1595_v29 }
 0x117   : > { %1575 = vmatmul.mubr.msk.f32.vlgmr.msra.gmra.mrb[0].mxu0 %vm803_vm11, %v776_v38 }
 0x118   : > { %1577 = vmatprep.mubr.msk.f32.mxu0 %vm803_vm11, %v777_v39 }
 0x11b   : > { %1578 = vmatmul.mubr.msk.f32.gmra.mrb[2].mxu0 %vm803_vm11, %v778_v19 }
 0x1ea   : > { %v1576_v1 = vpop.f32.mrb[0].mxu0 }
 0x1eb   : > { %v2336_v14 = vadd.f32 %v1576_v1, %v791_v25  ;;  %v882_v43 = vpop.f32.mrb[1].mxu0 }
 0x1ec   : > { %v2338_v28 = vadd.f32 %v882_v43, %v786_v42 }
 0x1ed   : > { %v1005_v36 = vand.u32 2147483647, %v2336_v14  ;;  %v1008_v48 = vand.u32 2139095040, %v2336_v14 }
 0x1ee   : > { %v901_v54 = vand.u32 2147483647, %v2338_v28  ;;  %v904_v45 = vand.u32 2139095040, %v2338_v28  ;;  %v1579_v53 = vpop.f32.mrb[2].mxu0 }
 0x1ef   : > { %v1009_v7 = vshrl.u32 %v1008_v48, 23  ;;  %v1012_v32 = vand.u32 8388607, %v1005_v36  ;;  %v2346_v11 = vadd.f32 %v1579_v53, %v801_v51  ;;  %v892_v8 = vpop.f32.mrb[3].mxu0 }
 0x1f0   : > { %v905_v16 = vshrl.u32 %v904_v45, 23  ;;  %v908_v58 = vand.u32 8388607, %v901_v54  ;;  %v2351_v61 = vadd.f32 %v892_v8, %v796_v6 }
 0x1f1   : > { %v1532_v41 = vadd.s32 4294967169, %v1009_v7  ;;  %v1213_v37 = vand.u32 2147483647, %v2346_v11  ;;  %v1013_v10 = vor.u32 8388608, %v1012_v32  ;;  %v1216_v20 = vand.u32 2139095040, %v2346_v11 }
 0x1f2   : > { %v1528_v60 = vadd.s32 4294967169, %v905_v16  ;;  %v909_v63 = vor.u32 8388608, %v908_v58  ;;  %v1109_v46 = vand.u32 2147483647, %v2351_v61  ;;  %v1112_v40 = vand.u32 2139095040, %v2351_v61 }
 0x1f3   : > { %v1015_v55 = vadd.s32 1, %v1532_v41  ;;  %v1217_v3 = vshrl.u32 %v1216_v20, 23  ;;  %v2356_v24 = vand.u32 8388607, %v1213_v37  ;;  %v2363_v2 = vshll.u32 %v1013_v10, 8 }
 0x1f4   : > { %v911_v56 = vadd.s32 1, %v1528_v60  ;;  %v2365_v44 = vshll.u32 %v909_v63, 8 }
 0x1f5   : > { %vm1016_vm6 = vcmp.gt.s32.totalorder %v1015_v55, 0  ;;  %v1540_v4 = vadd.s32 4294967169, %v1217_v3  ;;  %v1221_v0 = vor.u32 8388608, %v2356_v24 }
 0x1f6   : > { %v1017_v62 = vsel %vm1016_vm6, %v1015_v55, 0  ;;  %vm912_vm7 = vcmp.gt.s32.totalorder %v911_v56, 0 }
 0x1f7   : > { %v1018_v9 = vshrl.u32 %v1017_v62, 5  ;;  %v1019_v5 = vand.u32 31, %v1017_v62  ;;  %v913_v12 = vsel %vm912_vm7, %v911_v56, 0  ;;  %v2373_v34 = vadd.s32 1, %v1540_v4 }
 0x1f8   : > { %v2367_v13 = vshrl.u32 %v913_v12, 5  ;;  %v915_v17 = vand.u32 31, %v913_v12 }
 0x1f9   : > { %v1020_v18 = vsub.s32 32, %v1019_v5  ;;  %v1022_v27 = vshll.u32 %v1821_v21, %v1019_v5  ;;  %v1025_v47 = vshll.u32 %v1822_v23, %v1019_v5  ;;  %v1028_v35 = vshll.u32 %v1823_v31, %v1019_v5 }
 0x1fa   : > { %v1031_v26 = vshll.u32 %v1819_v57, %v1019_v5  ;;  %v1034_v33 = vshll.u32 %v1818_v49, %v1019_v5  ;;  %vm1037_vm8 = vcmp.lt.s32.totalorder %v1018_v9, 1  ;;  %vm1038_vm9 = vcmp.lt.s32.totalorder %v1018_v9, 2 }
 0x1fb   : > { %v1023_v22 = vshrl.u32 %v1822_v23, %v1020_v18  ;;  %v1026_v30 = vshrl.u32 %v1823_v31, %v1020_v18  ;;  %v1029_v50 = vshrl.u32 %v1819_v57, %v1020_v18  ;;  %v1021_v52 = vshrl.u32 %v1821_v21, %v1020_v18 }
 0x1fc   : > { %v1032_v29 = vshrl.u32 %v1818_v49, %v1020_v18  ;;  %v1035_v38 = vshrl.u32 %v1820_v59, %v1020_v18  ;;  %vm1039_vm10 = vcmp.lt.s32.totalorder %v1018_v9, 3  ;;  %v916_v42 = vsub.s32 32, %v915_v17 }
 0x1fd   : > { %v1024_v39 = vor.u32 %v1023_v22, %v1022_v27  ;;  %v1027_v19 = vor.u32 %v1026_v30, %v1025_v47  ;;  %v1030_v25 = vor.u32 %v1029_v50, %v1028_v35  ;;  %vm1040_vm12 = vcmp.lt.s32.totalorder %v1018_v9, 4 }
 0x1fe   : > { %v1033_v1 = vor.u32 %v1032_v29, %v1031_v26  ;;  %v1036_v43 = vor.u32 %v1035_v38, %v1034_v33  ;;  %v918_v48 = vshll.u32 %v1821_v21, %v915_v17  ;;  %v921_v16 = vshll.u32 %v1822_v23, %v915_v17 }
 0x1ff   : > { %v1041_v51 = vsel %vm1037_vm8, %v1021_v52, %v1024_v39  ;;  %v1042_v45 = vsel %vm1040_vm12, %v1030_v25, 2102212464  ;;  %v1045_v53 = vsel %vm1037_vm8, %v1024_v39, %v1027_v19  ;;  %v1049_v7 = vsel %vm1037_vm8, %v1027_v19, %v1030_v25 }
 0x200   : > { %v1043_v32 = vsel %vm1039_vm10, %v1027_v19, %v1042_v45  ;;  %v1046_v8 = vsel %vm1040_vm12, %v1033_v1, 920167782  ;;  %v1050_v6 = vsel %vm1040_vm12, %v1036_v43, 1326507024  ;;  %v917_v10 = vshrl.u32 %v1821_v21, %v916_v42 }
 0x201   : > { %v1047_v58 = vsel %vm1039_vm10, %v1030_v25, %v1046_v8  ;;  %v1051_v41 = vsel %vm1039_vm10, %v1033_v1, %v1050_v6  ;;  %v919_v60 = vshrl.u32 %v1822_v23, %v916_v42  ;;  %v1044_v20 = vsel %vm1038_vm9, %v1041_v51, %v1043_v32 }
 0x202   : > { %v1048_v55 = vsel %vm1038_vm9, %v1045_v53, %v1047_v58  ;;  %v1052_v63 = vsel %vm1038_vm9, %v1049_v7, %v1051_v41  ;;  %v922_v56 = vshrl.u32 %v1823_v31, %v916_v42  ;;  %v924_v18 = vshll.u32 %v1823_v31, %v915_v17 }
 0x203   : > { %v2399_v3 = vmul.u32.u64.low %v2363_v2, %v1052_v63  ;;  %v2400_v15 = vmul.u32.u64.high %v2363_v2, %v1052_v63, %v2399_v3  ;;  %v2403_v62 = vmul.u32.u64.low %v2363_v2, %v1048_v55  ;;  %v2404_v4 = vmul.u32.u64.high %v2363_v2, %v1048_v55, %v2403_v62 }
 0x204   : > { %v920_v5 = vor.u32 %v919_v60, %v918_v48  ;;  %v923_v12 = vor.u32 %v922_v56, %v921_v16  ;;  %v925_v27 = vshrl.u32 %v1819_v57, %v916_v42  ;;  %v1060_v9 = vmul.u32 %v2363_v2, %v1044_v20 }
 0x205   : > { %v927_v47 = vshll.u32 %v1819_v57, %v915_v17  ;;  %v928_v35 = vshrl.u32 %v1818_v49, %v916_v42  ;;  %v931_v26 = vshrl.u32 %v1820_v59, %v916_v42  ;;  %v930_v22 = vshll.u32 %v1818_v49, %v915_v17 }
 0x206   : > { %v926_v33 = vor.u32 %v925_v27, %v924_v18  ;;  %vm933_vm13 = vcmp.lt.s32.totalorder %v2367_v13, 1  ;;  %vm934_vm14 = vcmp.lt.s32.totalorder %v2367_v13, 2  ;;  %vm1062_vm15 = vc.u32 %v2400_v15, %v2403_v62 }
 0x207   : > { %v1063_v30 = vadd.s32 1, %v2404_v4  ;;  %v929_v50 = vor.u32 %v928_v35, %v927_v47  ;;  %vm935_vm0 = vcmp.lt.s32.totalorder %v2367_v13, 3  ;;  %v932_v2 = vor.u32 %v931_v26, %v930_v22 }
 0x208   : > { %vm936_vm1 = vcmp.lt.s32.totalorder %v2367_v13, 4  ;;  %v937_v52 = vsel %vm933_vm13, %v917_v10, %v920_v5  ;;  %v941_v29 = vsel %vm933_vm13, %v920_v5, %v923_v12  ;;  %v945_v19 = vsel %vm933_vm13, %v923_v12, %v926_v33 }
 0x209   : > { %v1064_v38 = vsel %vm1062_vm15, %v1063_v30, %v2404_v4  ;;  %v938_v17 = vsel %vm936_vm1, %v926_v33, 2102212464  ;;  %v942_v39 = vsel %vm936_vm1, %v929_v50, 920167782  ;;  %v946_v43 = vsel %vm936_vm1, %v932_v2, 1326507024 }
 0x20a   : > { %v1065_v25 = vadd.s32 %v1064_v38, %v1060_v9  ;;  %v939_v42 = vsel %vm935_vm0, %v923_v12, %v938_v17  ;;  %v943_v1 = vsel %vm935_vm0, %v926_v33, %v942_v39  ;;  %v947_v45 = vsel %vm935_vm0, %v929_v50, %v946_v43 }
 0x20b   : > { %v940_v48 = vsel %vm934_vm14, %v937_v52, %v939_v42  ;;  %v944_v51 = vsel %vm934_vm14, %v941_v29, %v943_v1  ;;  %vm1224_vm2 = vcmp.gt.s32.totalorder %v2373_v34, 0  ;;  %v948_v7 = vsel %vm934_vm14, %v945_v19, %v947_v45 }
 0x20c   : > { %v1066_v53 = vadd.s32 536870912, %v1065_v25  ;;  %v2430_v32 = vmul.u32.u64.low %v2365_v44, %v944_v51  ;;  %v2431_v8 = vmul.u32.u64.high %v2365_v44, %v944_v51, %v2430_v32  ;;  %v1225_v58 = vsel %vm1224_vm2, %v2373_v34, 0 }
 0x20d   : > { %v2435_v6 = vmul.u32.u64.low %v2365_v44, %v948_v7  ;;  %v2436_v16 = vmul.u32.u64.high %v2365_v44, %v948_v7, %v2435_v6  ;;  %v1113_v41 = vshrl.u32 %v1112_v40, 23  ;;  %v1227_v60 = vand.u32 31, %v1225_v58 }
 0x20e   : > { %v2441_v10 = vshrl.u32 %v1066_v53, 30  ;;  %v956_v13 = vmul.u32 %v2365_v44, %v940_v48  ;;  %v2446_v20 = vshll.u32 %v1221_v0, 8  ;;  %v2450_v55 = vand.u32 8388607, %v1109_v46 }
 0x20f   : > { %v959_v34 = vadd.s32 1, %v2431_v8  ;;  %v1226_v56 = vshrl.u32 %v1225_v58, 5  ;;  %v1228_v3 = vsub.s32 32, %v1227_v60  ;;  %vm958_vm3 = vc.u32 %v2436_v16, %v2430_v32 }
 0x210   : > { %v1068_v63 = vshll.u32 %v2441_v10, 30  ;;  %v1230_v40 = vshll.u32 %v1821_v21, %v1227_v60  ;;  %v1233_v44 = vshll.u32 %v1822_v23, %v1227_v60  ;;  %v1536_v24 = vadd.s32 4294967169, %v1113_v41 }
 0x211   : > { %v960_v4 = vsel %vm958_vm3, %v959_v34, %v2431_v8  ;;  %v1231_v5 = vshrl.u32 %v1822_v23, %v1228_v3  ;;  %v1236_v12 = vshll.u32 %v1823_v31, %v1227_v60  ;;  %v1234_v27 = vshrl.u32 %v1823_v31, %v1228_v3 }
 0x212   : > { %v2458_v0 = vsub.s32 %v1065_v25, %v1068_v63  ;;  %v961_v18 = vadd.s32 %v960_v4, %v956_v13  ;;  %v1237_v9 = vshrl.u32 %v1819_v57, %v1228_v3  ;;  %v1239_v47 = vshll.u32 %v1819_v57, %v1227_v60 }
 0x213   : > { %v1232_v26 = vor.u32 %v1231_v5, %v1230_v40  ;;  %v1240_v33 = vshrl.u32 %v1818_v49, %v1228_v3  ;;  %v1242_v22 = vshll.u32 %v1818_v49, %v1227_v60  ;;  %v1235_v50 = vor.u32 %v1234_v27, %v1233_v44 }
 0x214   : > { %v1071_v35 = vsub.s32 0, %v2458_v0  ;;  %v962_v30 = vadd.s32 536870912, %v961_v18  ;;  %v1238_v2 = vor.u32 %v1237_v9, %v1236_v12  ;;  %v1243_v52 = vshrl.u32 %v1820_v59, %v1228_v3 }
 0x215   : > { %v1229_v38 = vshrl.u32 %v1821_v21, %v1228_v3  ;;  %v1241_v17 = vor.u32 %v1240_v33, %v1239_v47  ;;  %vm1245_vm4 = vcmp.lt.s32.totalorder %v1226_v56, 1  ;;  %vm1247_vm5 = vcmp.lt.s32.totalorder %v1226_v56, 3 }
 0x216   : > { %v1533_v29 = vmin.u32 %v1071_v35, %v2458_v0  ;;  %v963_v39 = vshrl.u32 %v962_v30, 30  ;;  %v1244_v19 = vor.u32 %v1243_v52, %v1242_v22  ;;  %vm1248_vm6 = vcmp.lt.s32.totalorder %v1226_v56, 4 }
 0x217   : > { %v1249_v42 = vsel %vm1245_vm4, %v1229_v38, %v1232_v26  ;;  %v1250_v1 = vsel %vm1248_vm6, %v1238_v2, 2102212464  ;;  %v1253_v43 = vsel %vm1245_vm4, %v1232_v26, %v1235_v50  ;;  %v1254_v45 = vsel %vm1248_vm6, %v1241_v17, 920167782 }
 0x218   : > { %v1073_v25 = vclz %v1533_v29  ;;  %v964_v48 = vshll.u32 %v963_v39, 30  ;;  %v1251_v51 = vsel %vm1247_vm5, %v1235_v50, %v1250_v1  ;;  %v1257_v53 = vsel %vm1245_vm4, %v1235_v50, %v1238_v2 }
 0x219   : > { %vm1246_vm7 = vcmp.lt.s32.totalorder %v1226_v56, 2  ;;  %v1255_v8 = vsel %vm1247_vm5, %v1238_v2, %v1254_v45  ;;  %v1258_v6 = vsel %vm1248_vm6, %v1244_v19, 1326507024  ;;  %v1061_v12 = vadd.s32 %v2403_v62, %v2400_v15 }
 0x21a   : > { %v1534_v7 = vadd.s32 4294967294, %v1073_v25  ;;  %v2474_v58 = vsub.s32 %v961_v18, %v964_v48  ;;  %v1252_v41 = vsel %vm1246_vm7, %v1249_v42, %v1251_v51  ;;  %v1256_v60 = vsel %vm1246_vm7, %v1253_v43, %v1255_v8 }
 0x21b   : > { %v1259_v13 = vsel %vm1247_vm5, %v1241_v17, %v1258_v6  ;;  %v2478_v34 = vmul.u32.u64.low %v2446_v20, %v1256_v60  ;;  %v2479_v3 = vmul.u32.u64.high %v2446_v20, %v1256_v60, %v2478_v34  ;;  %v1119_v27 = vadd.s32 1, %v1536_v24 }
 0x21c   : > { %vm1535_vm8 = vcmp.lt.s32.totalorder %v1534_v7, 0  ;;  %v1260_v63 = vsel %vm1246_vm7, %v1257_v53, %v1259_v13  ;;  %v967_v44 = vsub.s32 0, %v2474_v58  ;;  %v1268_v35 = vmul.u32 %v2446_v20, %v1252_v41 }
 0x21d   : > { %v1076_v40 = vsel %vm1535_vm8, 0, %v1534_v7  ;;  %v2484_v4 = vmul.u32.u64.low %v2446_v20, %v1260_v63  ;;  %v2485_v5 = vmul.u32.u64.high %v2446_v20, %v1260_v63, %v2484_v4  ;;  %v1117_v26 = vor.u32 8388608, %v2450_v55 }
 0x21e   : > { %v1077_v18 = vsub.s32 32, %v1076_v40  ;;  %v1081_v56 = vsub.s32 4294967266, %v1076_v40  ;;  %v1078_v9 = vshll.u32 %v2458_v0, %v1076_v40  ;;  %v1529_v47 = vmin.u32 %v967_v44, %v2474_v58 }
 0x21f   : > { %v1271_v30 = vadd.s32 1, %v2479_v3  ;;  %vm1120_vm9 = vcmp.gt.s32.totalorder %v1119_v27, 0  ;;  %vm1270_vm10 = vc.u32 %v2485_v5, %v2478_v34  ;;  %v987_v62 = vsub.s32 4, %v963_v39 }
 0x220   : > { %v1079_v33 = vshrl.u32 %v1061_v12, %v1077_v18  ;;  %v1082_v22 = vadd.s32 127, %v1081_v56  ;;  %v969_v50 = vclz %v1529_v47  ;;  %v1121_v15 = vsel %vm1120_vm9, %v1119_v27, 0 }
 0x221   : > { %vm903_vm12 = vcmp.lt.s32.totalorder %v2338_v28, 0  ;;  %v1272_v0 = vsel %vm1270_vm10, %v1271_v30, %v2479_v3  ;;  %v957_v20 = vadd.s32 %v2430_v32, %v2436_v16  ;;  %v1123_v29 = vand.u32 31, %v1121_v15 }
 0x222   : > { %v1080_v24 = vor.u32 %v1079_v33, %v1078_v9  ;;  %v1083_v2 = vshll.u32 %v1082_v22, 23  ;;  %v1530_v55 = vadd.s32 4294967294, %v969_v50  ;;  %v1273_v52 = vadd.s32 %v1272_v0, %v1268_v35 }
 0x223   : > { %v2500_v17 = vshrl.u32 %v1121_v15, 5  ;;  %v2502_v19 = vshll.u32 %v1117_v26, 8  ;;  %v1091_v25 = vsub.s32 4, %v2441_v10  ;;  %v1124_v1 = vsub.s32 32, %v1123_v29 }
 0x224   : > { %v1084_v38 = vor.u32 4788187, %v1083_v2  ;;  %vm1531_vm13 = vcmp.lt.s32.totalorder %v1530_v55, 0  ;;  %v1274_v42 = vadd.s32 536870912, %v1273_v52  ;;  %v2507_v43 = vsel %vm903_vm12, %v987_v62, %v963_v39 }
 0x225   : > { %v1087_v51 = vcvt.s32.f32 %v1080_v24  ;;  %v972_v32 = vsel %vm1531_vm13, 0, %v1530_v55  ;;  %v1126_v16 = vshll.u32 %v1821_v21, %v1123_v29  ;;  %v1129_v8 = vshll.u32 %v1822_v23, %v1123_v29 }
 0x226   : > { %v1085_v48 = vand.u32 2147483647, %v1084_v38  ;;  %v973_v45 = vsub.s32 32, %v972_v32  ;;  %v977_v53 = vsub.s32 4294967266, %v972_v32  ;;  %v2510_v7 = vshrl.u32 %v1274_v42, 30 }
 0x227   : > { %v974_v41 = vshll.u32 %v2474_v58, %v972_v32  ;;  %v1127_v60 = vshrl.u32 %v1822_v23, %v1124_v1  ;;  %v1130_v13 = vshrl.u32 %v1823_v31, %v1124_v1  ;;  %vm1007_vm14 = vcmp.lt.s32.totalorder %v2336_v14, 0 }
 0x228   : > { %v1088_v6 = vmul.f32 %v1087_v51, %v1085_v48  ;;  %v975_v39 = vshrl.u32 %v957_v20, %v973_v45  ;;  %v978_v63 = vadd.s32 127, %v977_v53  ;;  %v1276_v3 = vshll.u32 %v2510_v7, 30 }
 0x229   : > { %v1133_v40 = vshrl.u32 %v1819_v57, %v1124_v1  ;;  %v1128_v44 = vor.u32 %v1127_v60, %v1126_v16  ;;  %v1131_v4 = vor.u32 %v1130_v13, %v1129_v8  ;;  %v1132_v12 = vshll.u32 %v1823_v31, %v1123_v29 }
 0x22a   : > { %vm1141_vm15 = vcmp.lt.s32.totalorder %v2500_v17, 1  ;;  %v976_v18 = vor.u32 %v975_v39, %v974_v41  ;;  %v979_v58 = vshll.u32 %v978_v63, 23  ;;  %v2521_v56 = vsub.s32 %v1273_v52, %v1276_v3 }
 0x22b   : > { %v1135_v23 = vshll.u32 %v1819_v57, %v1123_v29  ;;  %v1134_v27 = vor.u32 %v1133_v40, %v1132_v12  ;;  %v1136_v9 = vshrl.u32 %v1818_v49, %v1124_v1  ;;  %v1138_v47 = vshll.u32 %v1818_v49, %v1123_v29 }
 0x22c   : > { %v1139_v35 = vshrl.u32 %v1820_v59, %v1124_v1  ;;  %v1089_v26 = vxor.u32 2147483648, %v1088_v6  ;;  %v980_v33 = vor.u32 4788187, %v979_v58  ;;  %v1279_v22 = vsub.s32 0, %v2521_v56 }
 0x22d   : > { %v1125_v31 = vshrl.u32 %v1821_v21, %v1124_v1  ;;  %v983_v30 = vcvt.s32.f32 %v976_v18  ;;  %v1137_v50 = vor.u32 %v1136_v9, %v1135_v23  ;;  %vm1143_vm0 = vcmp.lt.s32.totalorder %v2500_v17, 3 }
 0x22e   : > { %v1140_v15 = vor.u32 %v1139_v35, %v1138_v47  ;;  %v981_v62 = vand.u32 2147483647, %v980_v33  ;;  %v1541_v57 = vmin.u32 %v1279_v22, %v2521_v56  ;;  %vm1144_vm1 = vcmp.lt.s32.totalorder %v2500_v17, 4 }
 0x22f   : > { %v1149_v49 = vsel %vm1141_vm15, %v1128_v44, %v1131_v4  ;;  %v1146_v59 = vsel %vm1144_vm1, %v1134_v27, 2102212464  ;;  %v1150_v24 = vsel %vm1144_vm1, %v1137_v50, 920167782  ;;  %v1153_v2 = vsel %vm1141_vm15, %v1131_v4, %v1134_v27 }
 0x230   : > { %v1154_v0 = vsel %vm1144_vm1, %v1140_v15, 1326507024  ;;  %v984_v21 = vmul.f32 %v983_v30, %v981_v62  ;;  %v1281_v20 = vclz %v1541_v57  ;;  %vm1142_vm2 = vcmp.lt.s32.totalorder %v2500_v17, 2 }
 0x231   : > { %v1151_v55 = vsel %vm1143_vm0, %v1134_v27, %v1150_v24  ;;  %v1090_v52 = vsel %vm1007_vm14, %v1089_v26, %v1088_v6  ;;  %v1145_v29 = vsel %vm1141_vm15, %v1125_v31, %v1128_v44  ;;  %v1155_v42 = vsel %vm1143_vm0, %v1137_v50, %v1154_v0 }
 0x232   : > { %v1152_v38 = vsel %vm1142_vm2, %v1149_v49, %v1151_v55  ;;  %v985_v1 = vxor.u32 2147483648, %v984_v21  ;;  %v1542_v48 = vadd.s32 4294967294, %v1281_v20  ;;  %v1147_v51 = vsel %vm1143_vm0, %v1131_v4, %v1146_v59 }
 0x233   : > { %v1156_v32 = vsel %vm1142_vm2, %v1153_v2, %v1155_v42  ;;  %v2556_v53 = vmul.u32.u64.low %v2502_v19, %v1152_v38  ;;  %v2557_v8 = vmul.u32.u64.high %v2502_v19, %v1152_v38, %v2556_v53  ;;  %vm2564_vm4 = vcmp.le.f32.partialorder %v901_v54, 0.7853982 }
 0x234   : > { %v2552_v16 = vmul.u32.u64.low %v2502_v19, %v1156_v32  ;;  %v2553_v45 = vmul.u32.u64.high %v2502_v19, %v1156_v32, %v2552_v16  ;;  %v986_v6 = vsel %vm903_vm12, %v985_v1, %v984_v21  ;;  %vm1543_vm3 = vcmp.lt.s32.totalorder %v1542_v48, 0 }
 0x235   : > { %v1284_v60 = vsel %vm1543_vm3, 0, %v1542_v48  ;;  %v1148_v13 = vsel %vm1142_vm2, %v1145_v29, %v1147_v51  ;;  %v989_v39 = vsel %vm2564_vm4, %v2338_v28, %v986_v6  ;;  %vm2575_vm5 = vcmp.le.f32.partialorder %v1005_v36, 0.7853982 }
 0x236   : > { %v1289_v3 = vsub.s32 4294967266, %v1284_v60  ;;  %v990_v54 = vsel %vm2564_vm4, 0, %v2507_v43  ;;  %1721 = vcosq.f32 %v989_v39  ;;  %v1093_v17 = vsel %vm2575_vm5, %v2336_v14, %v1090_v52 }
 0x237   : > { %vm1166_vm6 = vc.u32 %v2553_v45, %v2556_v53  ;;  %v1167_v40 = vadd.s32 1, %v2557_v8  ;;  %1723 = vsinq.f32 %v989_v39  ;;  %v1092_v36 = vsel %vm1007_vm14, %v1091_v25, %v2441_v10 }
 0x238   : > { %v1285_v44 = vsub.s32 32, %v1284_v60  ;;  %v1290_v4 = vadd.s32 127, %v1289_v3  ;;  %v1164_v43 = vmul.u32 %v2502_v19, %v1148_v13  ;;  %v1269_v12 = vadd.s32 %v2478_v34, %v2485_v5 }
 0x239   : > { %v1168_v18 = vsel %vm1166_vm6, %v1167_v40, %v2557_v8  ;;  %v994_v58 = vadd.s32 3, %v990_v54  ;;  %1725 = vcosq.f32 %v1093_v17  ;;  %v1094_v9 = vsel %vm2575_vm5, 0, %v1092_v36 }
 0x23a   : > { %v1291_v23 = vshll.u32 %v1290_v4, 23  ;;  %v1169_v27 = vadd.s32 %v1168_v18, %v1164_v43  ;;  %1727 = vsinq.f32 %v1093_v17  ;;  %v1287_v47 = vshrl.u32 %v1269_v12, %v1285_v44 }
 0x23b   : > { %v1098_v10 = vadd.s32 3, %v1094_v9  ;;  %v1286_v25 = vshll.u32 %v2521_v56, %v1284_v60  ;;  %v995_v33 = vand.u32 3, %v994_v58  ;;  %vm993_vm10 = vweird.f32 %v2338_v28 }
 0x23c   : > { %v1170_v35 = vadd.s32 536870912, %v1169_v27  ;;  %v1292_v26 = vor.u32 4788187, %v1291_v23  ;;  %vm1097_vm15 = vweird.f32 %v2336_v14  ;;  %vm1215_vm1 = vcmp.lt.s32.totalorder %v2346_v11, 0 }
 0x23d   : > { %v1288_v5 = vor.u32 %v1287_v47, %v1286_v25  ;;  %v1099_v50 = vand.u32 3, %v1098_v10  ;;  %vm1000_vm7 = vcmp.eq.s32.totalorder %v995_v33, 2  ;;  %vm996_vm8 = vcmp.lt.s32.totalorder %v995_v33, 2 }
 0x23e   : > { %v2600_v19 = vshrl.u32 %v1170_v35, 30  ;;  %v1293_v15 = vand.u32 2147483647, %v1292_v26  ;;  %vm997_vm9 = vcmp.eq.s32.totalorder %v995_v33, 0  ;;  %v1165_v60 = vadd.s32 %v2556_v53, %v2553_v45 }
 0x23f   : > { %v1295_v24 = vcvt.s32.f32 %v1288_v5  ;;  %vm1104_vm12 = vcmp.eq.s32.totalorder %v1099_v50, 2  ;;  %vm1101_vm13 = vcmp.eq.s32.totalorder %v1099_v50, 0  ;;  %vm1100_vm14 = vcmp.lt.s32.totalorder %v1099_v50, 2 }
 0x240   : > { %v1722_v34 = vpop.eup %1721  ;;  %v1172_v22 = vshll.u32 %v2600_v19, 30  ;;  %vm2612_vm2 = vcmp.le.f32.partialorder %v1213_v37, 0.7853982  ;;  %v1299_v44 = vsub.s32 4, %v2510_v7  ;;  %v1195_v12 = vsub.s32 4, %v2600_v19 }
 0x241   : > { %v1724_v31 = vpop.eup %1723  ;;  %v1001_v30 = vxor.u32 2147483648, %v1722_v34  ;;  %v1296_v52 = vmul.f32 %v1295_v24, %v1293_v15  ;;  %vm1111_vm3 = vcmp.lt.s32.totalorder %v2351_v61, 0  ;;  %vm1110_vm4 = vcmp.le.f32.partialorder %v1109_v46, 0.7853982 }
 0x242   : > { %v1173_v62 = vsub.s32 %v1169_v27, %v1172_v22  ;;  %v998_v57 = vxor.u32 2147483648, %v1724_v31  ;;  %v1300_v37 = vsel %vm1215_vm1, %v1299_v44, %v2510_v7  ;;  %v1196_v27 = vsel %vm1111_vm3, %v1195_v12, %v2600_v19 }
 0x243   : > { %v1726_v49 = vpop.eup %1725  ;;  %v1002_v59 = vsel %vm1000_vm7, %v1001_v30, %v1724_v31  ;;  %v1297_v16 = vxor.u32 2147483648, %v1296_v52  ;;  %v1302_v58 = vsel %vm2612_vm2, 0, %v1300_v37  ;;  %v1198_v10 = vsel %vm1110_vm4, 0, %v1196_v27 }
 0x244   : > { %v1728_v56 = vpop.eup %1727  ;;  %v1175_v2 = vsub.s32 0, %v1173_v62  ;;  %v999_v0 = vsel %vm997_vm9, %v1722_v34, %v998_v57  ;;  %v1105_v21 = vxor.u32 2147483648, %v1726_v49  ;;  %v1306_v47 = vadd.s32 3, %v1302_v58 }
 0x245   : > { %v1003_v20 = vsel %vm996_vm8, %v999_v0, %v1002_v59  ;;  %v1102_v55 = vxor.u32 2147483648, %v1728_v56  ;;  %v1298_v41 = vsel %vm1215_vm1, %v1297_v16, %v1296_v52  ;;  %v1202_v26 = vadd.s32 3, %v1198_v10 }
 0x246   : > { %v1537_v29 = vmin.u32 %v1175_v2, %v1173_v62  ;;  %v1106_v38 = vsel %vm1104_vm12, %v1105_v21, %v1728_v56  ;;  %v1004_v42 = vsel %vm993_vm10, nan, %v1003_v20  ;;  %v1301_v17 = vsel %vm2612_vm2, %v2346_v11, %v1298_v41  ;;  %v1318_v2 = vld [vmem:[%s2697_s5 + $0x8] sm:$0xff] }
 0x247   : > { %v1103_v1 = vsel %vm1101_vm13, %v1726_v49, %v1102_v55  ;;  %1729 = vcosq.f32 %v1301_v17  ;;  %v1307_v25 = vand.u32 3, %v1306_v47  ;;  %v1203_v5 = vand.u32 3, %v1202_v26 }
 0x248   : > { %v1177_v48 = vclz %v1537_v29  ;;  %v1107_v51 = vsel %vm1100_vm14, %v1103_v1, %v1106_v38  ;;  %1731 = vsinq.f32 %v1301_v17  ;;  %vm1305_vm10 = vweird.f32 %v2346_v11  ;;  %v1329_v11 = vpop.permute.xlu1 %1328 }
 0x249   : > { %v1108_v32 = vsel %vm1097_vm15, nan, %v1107_v51  ;;  %vm1309_vm5 = vcmp.eq.s32.totalorder %v1307_v25, 0  ;;  %vm1312_vm6 = vcmp.eq.s32.totalorder %v1307_v25, 2  ;;  %vm1308_vm7 = vcmp.lt.s32.totalorder %v1307_v25, 2 }
 0x24a   : > { %v1538_v8 = vadd.s32 4294967294, %v1177_v48  ;;  %v1599_v6 = vpack.c.bf16 %v1108_v32, %v1004_v42  ;;  %vm1208_vm8 = vcmp.eq.s32.totalorder %v1203_v5, 2  ;;  %vm1205_vm9 = vcmp.eq.s32.totalorder %v1203_v5, 0 }
 0x24b   : > { %vm1204_vm12 = vcmp.lt.s32.totalorder %v1203_v5, 2  ;;  %vm1201_vm13 = vweird.f32 %v2351_v61 }
 0x24c   : > { %vm1539_vm0 = vcmp.lt.s32.totalorder %v1538_v8, 0  ;;  %1600 = vmatprep.subr.bf16.mxu1 %v1599_v6 }
 0x24d   : > { %v1180_v28 = vsel %vm1539_vm0, 0, %v1538_v8  ;;  %1602 = vmatpush3.bf16.msra.mxu1 %v1599_v6 }
 0x24e   : > { %v1181_v13 = vsub.s32 32, %v1180_v28  ;;  %v1185_v39 = vsub.s32 4294967266, %v1180_v28  ;;  %v1182_v63 = vshll.u32 %v1173_v62, %v1180_v28 }
 0x250   : > { %v1183_v3 = vshrl.u32 %v1165_v60, %v1181_v13  ;;  %v1186_v54 = vadd.s32 127, %v1185_v39 }
 0x251   : > { %v1730_v35 = vpop.eup %1729 }
 0x252   : > { %v1184_v40 = vor.u32 %v1183_v3, %v1182_v63  ;;  %v1187_v36 = vshll.u32 %v1186_v54, 23  ;;  %v1732_v7 = vpop.eup %1731  ;;  %v1313_v34 = vxor.u32 2147483648, %v1730_v35 }
 0x253   : > { %v1310_v33 = vxor.u32 2147483648, %v1732_v7 }
 0x254   : > { %v1188_v45 = vor.u32 4788187, %v1187_v36  ;;  %v1191_v4 = vcvt.s32.f32 %v1184_v40  ;;  %v1314_v46 = vsel %vm1312_vm6, %v1313_v34, %v1732_v7 }
 0x255   : > { %v1311_v22 = vsel %vm1309_vm5, %v1730_v35, %v1310_v33 }
 0x256   : > { %v1189_v53 = vand.u32 2147483647, %v1188_v45  ;;  %v1315_v50 = vsel %vm1308_vm7, %v1311_v22, %v1314_v46 }
 0x257   : > { %v1316_v49 = vsel %vm1305_vm10, nan, %v1315_v50 }
 0x258   : > { %v1192_v43 = vmul.f32 %v1191_v4, %v1189_v53 }
 0x25a   : > { %v1193_v18 = vxor.u32 2147483648, %v1192_v43 }
 0x25c   : > { %v1194_v23 = vsel %vm1111_vm3, %v1193_v18, %v1192_v43 }
 0x25d   : > { %v1197_v9 = vsel %vm1110_vm4, %v2351_v61, %v1194_v23  ;;  %v1324_v61 = vpop.permute.xlu0 %1323 }
 0x25e   : > { %1733 = vcosq.f32 %v1197_v9 }
 0x25f   : > { %1735 = vsinq.f32 %v1197_v9 }
 0x268   : > { %v1734_v31 = vpop.eup %1733 }
 0x269   : > { %v1736_v19 = vpop.eup %1735  ;;  %v1209_v30 = vxor.u32 2147483648, %v1734_v31 }
 0x26a   : > { %v1206_v15 = vxor.u32 2147483648, %v1736_v19 }
 0x26b   : > { %v1210_v62 = vsel %vm1208_vm8, %v1209_v30, %v1736_v19 }
 0x26c   : > { %v1207_v57 = vsel %vm1205_vm9, %v1734_v31, %v1206_v15 }
 0x26d   : > { %v1211_v59 = vsel %vm1204_vm12, %v1207_v57, %v1210_v62 }
 0x26e   : > { %v1212_v56 = vsel %vm1201_vm13, nan, %v1211_v59 }
 0x26f   : > { %v1603_v24 = vpack.c.bf16 %v1316_v49, %v1212_v56 }
 0x271   : > { %1604 = vmatprep.subr.bf16.mxu1 %v1603_v24 }
 0x272   : > { %1606 = vmatpush3.bf16.msra.mxu1 %v1603_v24 }
 0x275   : > { %1589 = vmatmul.mubr.msk.f32.vlgmr.msra.gmra.mrb[0].mxu1 %vm803_vm11, %v1318_v2 }
 0x348   : > { %v1590_v0 = vpop.f32.mrb[0].mxu1 }
 0x349   : > { %v1409_v21 = vadd.f32 %v1590_v0, %v1329_v11  ;;  %v1403_v20 = vpop.f32.mrb[1].mxu1 }
 0x34a   : > { %v1404_v55 = vadd.f32 %v1403_v20, %v1324_v61 }
 0x34b   : > { %1413 = vst [vmem:[%s289_s22 + $0x8] sm:$0xff] %v1409_v21 }
 0x34c   : > { %1412 = vst [vmem:[%s289_s22] sm:$0xff] %v1404_v55 }
 0x34d   : > { %1750 = shalt.err (!%p1747_p5)
}
 0x34e   : > { %s1751_s19 = scalar_lea.hbm %s2644_s12, 256  ;;  %s1755_s22 = scalar_lea.hbm %s2699_s7, 512 }
 0x34f   : > { %p1752_p6 = scmp.ne.s32.totalorder %s2644_s12, %s1751_s19  ;;  %p1756_p10 = scmp.lt.u32.totalorder %s2644_s12, %s2699_s7 }
 0x350   : > { %p1757_p11 = scmp.lt.u32.totalorder %s1755_s22, %s1751_s19  ;;  %p1759_p13 = scmp.lt.u32.totalorder %s1751_s19, %s2644_s12 }
 0x351   : > { %p1753_p7 = pnand %p1752_p6, %p1907_p4 }
 0x352   : > { %p1758_p12 = por %p1757_p11, %p1756_p10 }
 0x353   : > { %p1754_p9 = pneg %p1753_p7 }
 0x354   : > { %p1760_p0 = por %p1759_p13, %p1758_p12 }
 0x356   : > { %p1761_p1 = pnand %p1760_p0, %p1754_p9 }
 0x358   : > { %1764 = shalt.err (!%p1761_p1)
}
 0x359   : > { %s1825_s10 = smov 128   ;;  %s1826_s27 = smov 8  }
 0x35a   : > { %1639 = dma.vmem_to_hbm [thread:$0]  (%p1907_p4), %s2639_s23, 256, %s2644_s12, %s2646_s15, %s1825_s10, %s1825_s10, %s1826_s27  }
 0x35b PF: > { %p1645_p2 = scmp.ge.s32.totalorder %s1815_s29, 2  ;;  %s1444_s16 = sand.u32 1, %s1795_s24  }
 0x35c   : > { %s1445_s17 = scalar_lea.sflag [#allocation3], %s1444_s16 }
 0x35d   : > { %p1642_p3 = pnand %p1645_p2, %p1914_p8 }
 0x35f   : > { %1790 = dma.done.wait (!%p1642_p3), %s1445_s17, 256  }
 0x360   : > { %1792 = vsyncadd (!%p1642_p3), %s1445_s17, 4294967040  ;;  %s20_s29 = sadd.s32 1, %s1815_s29   ;;  %s2714_s24 = smov %s1799_s25 }
 0x361   : > { %p17_p5 = scmp.ge.s32.totalorder %s20_s29, 4   ;;  %s2715_s25 = smov %s1803_s26 }
 0x362   : > { %s2716_s26 = smov %s1920_s14  ;;  %s2717_s27 = smov %s1811_s28 }
 0x363   : > { %s2718_s28 = smov %s2720_s9  ;;  %19 = sbr.rel (!%p17_p5) target bundleno = 4 (0x4), region = 83 }
 0x36a   :  { %1450 = vsyncpa [#allocation3], 1 }
 0x36b   :  { %1452 = vsyncpa [#allocation3 + $0x1], 1 }

</bundles_post_ra>
